<compile_context>
chip_gen: v5e
topology: v5e:2x2
jax: 0.10.0
libtpu: 0.0.40
codegen_flags: <defaults>
</compile_context>

<pallas_src>
import jax
import jax.numpy as jnp
from jax.experimental import pallas as pl
from jax.experimental.pallas import tpu as pltpu

_H1, _H2 = 512, 256          # hidden sizes of the two hidden layers
_OUT_LANES = 128             # lane-padded width of the 1-wide output layer
_VMEM_L1_BUDGET = 24 << 20   # layer-1 streaming budget; fits v7x's 64 MiB VMEM


def _round_up(x, m):
    return (x + m - 1) // m * m


def _plan_layer1_k(d, block_batch):
    """Pick the layer-1 K tiling.

    Full-K (no tiling, no x padding) whenever the resident bf16 w1 plus the
    double-buffered x tiles fit the budget; otherwise a 128-multiple K tile
    small enough to fit (only triggers for very large D, mainly on v7x).
    Returns (tk, d_pad, k_tiles).
    """
    full_bytes = d * _H1 * 2 + 2 * block_batch * d * 4
    if full_bytes <= _VMEM_L1_BUDGET:
        return d, d, 1
    tk = 4096
    while tk > 128 and (2 * tk * _H1 * 2 + 2 * block_batch * tk * 4) > _VMEM_L1_BUDGET:
        tk //= 2
    d_pad = _round_up(d, tk)
    return tk, d_pad, d_pad // tk


def _disc_kernel(b3_ref, x_ref, w1_ref, b1_ref, w2_ref, b2_ref, w3_ref,
                 out_ref, acc_ref):
    """Grid = (batch_tiles, k_tiles).  acc_ref: f32 (TB, 512) layer-1 accumulator."""
    k = pl.program_id(1)

    @pl.when(k == 0)
    def _():
        acc_ref[...] = jnp.zeros_like(acc_ref)

    # Layer-1 partial product for this K tile: bf16 MXU feed, f32 accumulation.
    x = x_ref[...].astype(jnp.bfloat16)
    acc_ref[...] += jnp.dot(x, w1_ref[...], preferred_element_type=jnp.float32)

    @pl.when(k == pl.num_programs(1) - 1)
    def _():
        h = acc_ref[...] + b1_ref[...]
        h = jnp.maximum(h, 0.2 * h)                       # LeakyReLU(0.2), f32
        h = jnp.dot(h.astype(jnp.bfloat16), w2_ref[...],
                    preferred_element_type=jnp.float32) + b2_ref[...]
        h = jnp.maximum(h, 0.2 * h)                       # LeakyReLU(0.2), f32
        v = jnp.dot(h.astype(jnp.bfloat16), w3_ref[...],
                    preferred_element_type=jnp.float32)   # (TB, 128); col 0 real
        out_ref[...] = (v[:, :1] + b3_ref[0, 0]).astype(out_ref.dtype)


def prepare_params(params, *, block_batch=512):
    """One-time weight prep (pads + bf16 casts), hoisted out of the forward path
    so it does not re-stream ~MBs of weights through HBM on every call."""
    w1, b1, w2, b2, w3, b3 = params
    d = w1.shape[0]
    tk, d_pad, k_tiles = _plan_layer1_k(d, block_batch)
    if d_pad != d:
        w1 = jnp.pad(w1, ((0, d_pad - d), (0, 0)))        # zero pad K: exact math
    w3p = jnp.pad(w3, ((0, 0), (0, _OUT_LANES - w3.shape[1])))
    return dict(
        w1=jnp.asarray(w1, jnp.bfloat16),
        b1=jnp.asarray(b1, jnp.float32).reshape(1, _H1),
        w2=jnp.asarray(w2, jnp.bfloat16),
        b2=jnp.asarray(b2, jnp.float32).reshape(1, _H2),
        w3=jnp.asarray(w3p, jnp.bfloat16),
        b3=jnp.asarray(b3, jnp.float32).reshape(1, 1),
        d=d, d_pad=d_pad, tk=tk, k_tiles=k_tiles, block_batch=block_batch,
    )


def discriminator_forward(img, prep):
    """img: (N, C, H, W) float32. Returns validity: (N, 1) float32."""
    n = img.shape[0]
    x = img.reshape(n, -1).astype(jnp.float32)   # same as torch .view(N, -1); free
    d, d_pad = prep["d"], prep["d_pad"]
    tk, k_tiles = prep["tk"], prep["k_tiles"]
    block_batch = prep["block_batch"]
    assert x.shape[1] == d

    # Large-D K-tiled path only: zero-pad K (required for the tiling).  Since
    # that pass touches x anyway, fuse the bf16 cast into it (halves the
    # kernel's dominant DMA stream for free).  Common path: no wrapper pass.
    if d_pad != d:
        x = jnp.pad(x, ((0, 0), (0, d_pad - d))).astype(jnp.bfloat16)

    # Batch tile: multiple of 16; force >= 2 grid steps when the batch allows
    # so v7x's two TensorCores both get work and the x DMA overlaps compute.
    n16 = _round_up(n, 16)
    target_steps = 1 if n16 <= 16 else max(2, pl.cdiv(n16, block_batch))
    tb = _round_up(pl.cdiv(n16, target_steps), 16)
    steps = pl.cdiv(n16, tb)
    n_pad = steps * tb
    if n_pad != n:
        x = jnp.pad(x, ((0, n_pad - n), (0, 0)))          # only when actually needed

    w1, b1, w2, b2, w3, b3 = (prep["w1"], prep["b1"], prep["w2"],
                              prep["b2"], prep["w3"], prep["b3"])

    resident = lambda arr: pl.BlockSpec(arr.shape, lambda i, k: (0, 0))

    # Advisory cost estimate for XLA's scheduler.
    flops = int(2 * n_pad * (d_pad * _H1 + _H1 * _H2 + _H2 * _OUT_LANES))
    bytes_accessed = int(
        x.size * x.dtype.itemsize
        + (w1.size + w2.size + w3.size) * 2
        + (b1.size + b2.size + b3.size) * 4
        + n_pad * 4
    )

    # VMEM budget from the actual footprint (double-buffer everything the
    # pipeline may double-buffer), capped by this chip's physical VMEM.
    x_isz = x.dtype.itemsize
    footprint = 2 * (tb * tk * x_isz + tb * 4 + tk * _H1 * 2)   # x/out/w1 tiles
    footprint += (w2.size + w3.size) * 2 + (b1.size + b2.size) * 4
    footprint += tb * _H1 * 4                                    # f32 accumulator
    footprint += tb * (_H1 + _H2 + _OUT_LANES) * 4               # f32 intermediates
    try:
        vmem_cap = int(pltpu.get_tpu_info().vmem_capacity_bytes)
    except Exception:
        vmem_cap = 64 << 20                                      # conservative (v7x)
    vmem_limit = int(min(max(2 * footprint, 16 << 20), (vmem_cap * 3) // 4))

    out = pl.pallas_call(
        _disc_kernel,
        out_shape=jax.ShapeDtypeStruct((n_pad, 1), jnp.float32),
        grid=(steps, k_tiles),
        in_specs=[
            pl.BlockSpec(memory_space=pltpu.MemorySpace.SMEM),    # b3 scalar
            pl.BlockSpec((tb, tk), lambda i, k: (i, k)),          # x: batch/K tiled
            pl.BlockSpec((tk, _H1), lambda i, k: (k, 0)),         # w1: K tiled
            resident(b1), resident(w2), resident(b2), resident(w3),
        ],
        out_specs=pl.BlockSpec((tb, 1), lambda i, k: (i, 0)),
        scratch_shapes=[pltpu.VMEM((tb, _H1), jnp.float32)],
        compiler_params=pltpu.CompilerParams(
            dimension_semantics=("parallel", "arbitrary"),
            vmem_limit_bytes=vmem_limit,
        ),
        cost_estimate=pl.CostEstimate(
            flops=flops, transcendentals=0, bytes_accessed=bytes_accessed),
    )(b3, x, w1, b1, w2, b2, w3)

    return out[:n] if n_pad != n else out


def init_params(key, in_features):
    """Deterministic init matching PyTorch nn.Linear default:
    U(-1/sqrt(fan_in), 1/sqrt(fan_in)) for weight and bias.
    Weights stored as (in_features, out_features)."""
    dims = [(in_features, _H1), (_H1, _H2), (_H2, 1)]
    params = []
    for (fan_in, fan_out) in dims:
        key, kw, kb = jax.random.split(key, 3)
        bound = 1.0 / jnp.sqrt(fan_in)
        w = jax.random.uniform(kw, (fan_in, fan_out), jnp.float32, -bound, bound)
        b = jax.random.uniform(kb, (1, fan_out), jnp.float32, -bound, bound)
        params += [w, b]
    return tuple(params)


if __name__ == "__main__":
    # Small shapes consistent with img_shape = (channels, img_size, img_size).
    # img_size=28 gives D=784 (non-128-multiple K path); batch=2 exercises the
    # batch-pad-to-TB path.
    batch, channels, img_size = 2, 1, 28
    in_features = channels * img_size * img_size  # 784

    key = jax.random.PRNGKey(0)
    k_img, k_params = jax.random.split(key)
    img = jax.random.normal(k_img, (batch, channels, img_size, img_size), jnp.float32)
    params = init_params(k_params, in_features)

    prep = prepare_params(params)                 # one-time weight prep
    validity = discriminator_forward(img, prep)
    validity = jax.block_until_ready(validity)

    # Pure-JAX reference with the same bf16-feeds / f32-accumulate recipe.
    x = img.reshape(batch, -1)
    w1, b1, w2, b2, w3, b3 = params
    h = jnp.dot(x.astype(jnp.bfloat16), w1.astype(jnp.bfloat16),
                preferred_element_type=jnp.float32) + b1
    h = jnp.maximum(h, 0.2 * h)
    h = jnp.dot(h.astype(jnp.bfloat16), w2.astype(jnp.bfloat16),
                preferred_element_type=jnp.float32) + b2
    h = jnp.maximum(h, 0.2 * h)
    ref = jnp.dot(h.astype(jnp.bfloat16), w3.astype(jnp.bfloat16),
                  preferred_element_type=jnp.float32) + b3

    assert validity.shape == (batch, 1)
    assert jnp.allclose(validity, ref, atol=2e-2, rtol=2e-2)

    print("KERNEL_OK")
</pallas_src>

<mosaic_0001>
module attributes {stable_mosaic.version = 11 : i64} {
  func.func @_disc_kernel(%arg0: i32, %arg1: i32, %arg2: memref<1x1xf32, #tpu.memory_space<smem>>, %arg3: memref<16x784xf32, #tpu.memory_space<vmem>>, %arg4: memref<784x512xbf16, #tpu.memory_space<vmem>>, %arg5: memref<1x512xf32, #tpu.memory_space<vmem>>, %arg6: memref<512x256xbf16, #tpu.memory_space<vmem>>, %arg7: memref<1x256xf32, #tpu.memory_space<vmem>>, %arg8: memref<256x128xbf16, #tpu.memory_space<vmem>>, %arg9: memref<16x1xf32, #tpu.memory_space<vmem>>, %arg10: memref<16x512xf32, #tpu.memory_space<vmem>>) attributes {dimension_semantics = [#tpu.dimension_semantics<parallel>, #tpu.dimension_semantics<arbitrary>], iteration_bounds = array<i64: 1, 1>, scalar_prefetch = 0 : i64, scratch_operands = 1 : i64, tpu.core_type = #tpu.core_type<tc>, window_params = [{transform_indices = @transform_0, window_bounds = array<i64: 1, 1>}, {transform_indices = @transform_1, window_bounds = array<i64: 16, 784>}, {transform_indices = @transform_2, window_bounds = array<i64: 784, 512>}, {pipeline_mode = #tpu.pipeline_mode<synchronous>, transform_indices = @transform_3, window_bounds = array<i64: 1, 512>}, {pipeline_mode = #tpu.pipeline_mode<synchronous>, transform_indices = @transform_4, window_bounds = array<i64: 512, 256>}, {pipeline_mode = #tpu.pipeline_mode<synchronous>, transform_indices = @transform_5, window_bounds = array<i64: 1, 256>}, {pipeline_mode = #tpu.pipeline_mode<synchronous>, transform_indices = @transform_6, window_bounds = array<i64: 256, 128>}, {transform_indices = @transform_7, window_bounds = array<i64: 16, 1>}]} {
    %c0_i32 = arith.constant 0 : i32
    %0 = arith.cmpi eq, %arg1, %c0_i32 : i32
    %1 = arith.extui %0 : i1 to i32
    %c0_i32_0 = arith.constant 0 : i32
    %2 = arith.cmpi ne, %1, %c0_i32_0 : i32
    scf.if %2 {
      %cst_10 = arith.constant 0.000000e+00 : f32
      %13 = vector.broadcast %cst_10 : f32 to vector<16x512xf32>
      %c0_11 = arith.constant 0 : index
      %c0_12 = arith.constant 0 : index
      %14 = vector.load %arg10[%c0_11, %c0_12] : memref<16x512xf32, #tpu.memory_space<vmem>>, vector<16x512xf32>
      tpu.vector_store %arg10[%c0_11, %c0_12], %13 {strides = array<i32>} : memref<16x512xf32, #tpu.memory_space<vmem>>, vector<16x512xf32>,
    } else {
    }
    %c0 = arith.constant 0 : index
    %c0_1 = arith.constant 0 : index
    %3 = vector.load %arg3[%c0, %c0_1] : memref<16x784xf32, #tpu.memory_space<vmem>>, vector<16x784xf32>
    %4 = arith.truncf %3 : vector<16x784xf32> to vector<16x784xbf16>
    %c0_2 = arith.constant 0 : index
    %c0_3 = arith.constant 0 : index
    %5 = vector.load %arg10[%c0_2, %c0_3] : memref<16x512xf32, #tpu.memory_space<vmem>>, vector<16x512xf32>
    %c0_4 = arith.constant 0 : index
    %c0_5 = arith.constant 0 : index
    %6 = vector.load %arg4[%c0_4, %c0_5] : memref<784x512xbf16, #tpu.memory_space<vmem>>, vector<784x512xbf16>
    %cst = arith.constant dense<0.000000e+00> : vector<16x512xf32>
    %7 = tpu.matmul %4, %6, %cst {dimension_numbers = #tpu.dot_dimension_numbers<[1], [0], [0], [1], [0, 0, 1, 1], [], []>} : vector<16x784xbf16>, vector<784x512xbf16>, vector<16x512xf32> -> vector<16x512xf32>
    %8 = arith.addf %5, %7 : vector<16x512xf32>
    %c0_6 = arith.constant 0 : index
    %c0_7 = arith.constant 0 : index
    %9 = vector.load %arg10[%c0_6, %c0_7] : memref<16x512xf32, #tpu.memory_space<vmem>>, vector<16x512xf32>
    tpu.vector_store %arg10[%c0_6, %c0_7], %8 {strides = array<i32>} : memref<16x512xf32, #tpu.memory_space<vmem>>, vector<16x512xf32>,
    %c0_i32_8 = arith.constant 0 : i32
    %10 = arith.cmpi eq, %arg1, %c0_i32_8 : i32
    %11 = arith.extui %10 : i1 to i32
    %c0_i32_9 = arith.constant 0 : i32
    %12 = arith.cmpi ne, %11, %c0_i32_9 : i32
    scf.if %12 {
      %c0_10 = arith.constant 0 : index
      %c0_11 = arith.constant 0 : index
      %13 = vector.load %arg10[%c0_10, %c0_11] : memref<16x512xf32, #tpu.memory_space<vmem>>, vector<16x512xf32>
      %c0_12 = arith.constant 0 : index
      %c0_13 = arith.constant 0 : index
      %14 = vector.load %arg5[%c0_12, %c0_13] : memref<1x512xf32, #tpu.memory_space<vmem>>, vector<1x512xf32>
      %15 = vector.broadcast %14 : vector<1x512xf32> to vector<16x512xf32>
      %16 = arith.addf %13, %15 : vector<16x512xf32>
      %cst_14 = arith.constant 2.000000e-01 : f32
      %17 = vector.broadcast %cst_14 : f32 to vector<16x512xf32>
      %18 = arith.mulf %17, %16 : vector<16x512xf32>
      %19 = arith.maximumf %16, %18 : vector<16x512xf32>
      %20 = arith.truncf %19 : vector<16x512xf32> to vector<16x512xbf16>
      %c0_15 = arith.constant 0 : index
      %c0_16 = arith.constant 0 : index
      %21 = vector.load %arg6[%c0_15, %c0_16] : memref<512x256xbf16, #tpu.memory_space<vmem>>, vector<512x256xbf16>
      %cst_17 = arith.constant dense<0.000000e+00> : vector<16x256xf32>
      %22 = tpu.matmul %20, %21, %cst_17 {dimension_numbers = #tpu.dot_dimension_numbers<[1], [0], [0], [1], [0, 0, 1, 1], [], []>} : vector<16x512xbf16>, vector<512x256xbf16>, vector<16x256xf32> -> vector<16x256xf32>
      %c0_18 = arith.constant 0 : index
      %c0_19 = arith.constant 0 : index
      %23 = vector.load %arg7[%c0_18, %c0_19] : memref<1x256xf32, #tpu.memory_space<vmem>>, vector<1x256xf32>
      %24 = vector.broadcast %23 : vector<1x256xf32> to vector<16x256xf32>
      %25 = arith.addf %22, %24 : vector<16x256xf32>
      %cst_20 = arith.constant 2.000000e-01 : f32
      %26 = vector.broadcast %cst_20 : f32 to vector<16x256xf32>
      %27 = arith.mulf %26, %25 : vector<16x256xf32>
      %28 = arith.maximumf %25, %27 : vector<16x256xf32>
      %29 = arith.truncf %28 : vector<16x256xf32> to vector<16x256xbf16>
      %c0_21 = arith.constant 0 : index
      %c0_22 = arith.constant 0 : index
      %30 = vector.load %arg8[%c0_21, %c0_22] : memref<256x128xbf16, #tpu.memory_space<vmem>>, vector<256x128xbf16>
      %cst_23 = arith.constant dense<0.000000e+00> : vector<16x128xf32>
      %31 = tpu.matmul %29, %30, %cst_23 {dimension_numbers = #tpu.dot_dimension_numbers<[1], [0], [0], [1], [0, 0, 1, 1], [], []>} : vector<16x256xbf16>, vector<256x128xbf16>, vector<16x128xf32> -> vector<16x128xf32>
      %32 = vector.extract_strided_slice %31 {offsets = [0, 0], sizes = [16, 1], strides = [1, 1]} : vector<16x128xf32> to vector<16x1xf32>
      %c0_24 = arith.constant 0 : index
      %c0_25 = arith.constant 0 : index
      %33 = memref.load %arg2[%c0_24, %c0_25] : memref<1x1xf32, #tpu.memory_space<smem>>
      %34 = vector.broadcast %33 : f32 to vector<16x1xf32>
      %35 = arith.addf %32, %34 : vector<16x1xf32>
      %c0_26 = arith.constant 0 : index
      %c0_27 = arith.constant 0 : index
      %36 = vector.load %arg9[%c0_26, %c0_27] : memref<16x1xf32, #tpu.memory_space<vmem>>, vector<16x1xf32>
      tpu.vector_store %arg9[%c0_26, %c0_27], %35 {strides = array<i32>} : memref<16x1xf32, #tpu.memory_space<vmem>>, vector<16x1xf32>,
    } else {
    }
    return
  }
  func.func @transform_0(%arg0: i32, %arg1: i32) -> (i32, i32) {
    %c0_i32 = arith.constant 0 : i32
    %c0_i32_0 = arith.constant 0 : i32
    %c0_i32_1 = arith.constant 0 : i32
    return %c0_i32, %c0_i32_0 : i32, i32
  }
  func.func @transform_1(%arg0: i32, %arg1: i32) -> (i32, i32) {
    %c0_i32 = arith.constant 0 : i32
    return %arg0, %arg1 : i32, i32
  }
  func.func @transform_2(%arg0: i32, %arg1: i32) -> (i32, i32) {
    %c0_i32 = arith.constant 0 : i32
    %c0_i32_0 = arith.constant 0 : i32
    return %arg1, %c0_i32 : i32, i32
  }
  func.func @transform_3(%arg0: i32, %arg1: i32) -> (i32, i32) {
    %c0_i32 = arith.constant 0 : i32
    %c0_i32_0 = arith.constant 0 : i32
    %c0_i32_1 = arith.constant 0 : i32
    return %c0_i32, %c0_i32_0 : i32, i32
  }
  func.func @transform_4(%arg0: i32, %arg1: i32) -> (i32, i32) {
    %c0_i32 = arith.constant 0 : i32
    %c0_i32_0 = arith.constant 0 : i32
    %c0_i32_1 = arith.constant 0 : i32
    return %c0_i32, %c0_i32_0 : i32, i32
  }
  func.func @transform_5(%arg0: i32, %arg1: i32) -> (i32, i32) {
    %c0_i32 = arith.constant 0 : i32
    %c0_i32_0 = arith.constant 0 : i32
    %c0_i32_1 = arith.constant 0 : i32
    return %c0_i32, %c0_i32_0 : i32, i32
  }
  func.func @transform_6(%arg0: i32, %arg1: i32) -> (i32, i32) {
    %c0_i32 = arith.constant 0 : i32
    %c0_i32_0 = arith.constant 0 : i32
    %c0_i32_1 = arith.constant 0 : i32
    return %c0_i32, %c0_i32_0 : i32, i32
  }
  func.func @transform_7(%arg0: i32, %arg1: i32) -> (i32, i32) {
    %c0_i32 = arith.constant 0 : i32
    %c0_i32_0 = arith.constant 0 : i32
    return %arg0, %c0_i32 : i32, i32
  }
}

</mosaic_0001>

<bundles_post_ra>
// kernel: tpu_custom_call.1
= control target key start
LH: loop header
LB: loop body
LE: loop exit
PB: predicated region body
PF: predicated region fallthrough
CT: control target
= control target key end

     0   :  { %13 = vsyncpa [#allocation5], 0  ;;  %s4123_s0 = inlined_call_operand.<no memory space> [shape: f32[1,1], index: 0, kind: input, shape index: {}]   ;;  %s4124_s1 = inlined_call_operand.hbm [shape: f32[16,784], index: 1, kind: input, shape index: {}]   ;;  %s4125_s2 = inlined_call_operand.hbm [shape: bf16[784,512], index: 2, kind: input, shape index: {}]   ;;  %s4126_s3 = inlined_call_operand.hbm [shape: f32[1,512], index: 3, kind: input, shape index: {}]   ;;  %s4127_s4 = inlined_call_operand.hbm [shape: bf16[512,256], index: 4, kind: input, shape index: {}]   ;;  %s4128_s5 = inlined_call_operand.vmem [shape: f32[1,256], index: 5, kind: input, shape index: {}]   ;;  %s4129_s6 = inlined_call_operand.hbm [shape: bf16[256,128], index: 6, kind: input, shape index: {}]   ;;  %s4130_s7 = inlined_call_operand.vmem [shape: f32[16,1], index: 7, kind: output, shape index: {}]  }
   0x1   :  { %14 = vsyncpa [#allocation7], 0  ;;  %s35_s26 = sshll.u32 %s4125_s2, 4  ;;  %s36_s26 = int_to_ptr.hbm [resolvable:$true] %s35_s26 }
   0x2   :  { %15 = vsyncpa [#allocation10], 0  ;;  %s3987_s27 = smov [#allocation6]   ;;  %s59_s8 = sshll.u32 %s4127_s4, 4  ;;  %s60_s8 = int_to_ptr.hbm [resolvable:$true] %s59_s8 }
   0x3   :  { %s37_s28 = sshll.u32 %s3987_s27, 4  ;;  %s3988_s9 = smov 256   ;;  %s38_s28 = int_to_ptr.vmem [resolvable:$true] %s37_s28 }
   0x4   :  { %s3989_s10 = smov 16   ;;  %s3990_s11 = smov [#allocation9]  }
   0x5   :  { %43 = dma.hbm_to_vmem [thread:$0]  %s36_s26, 25088, %s38_s28, [#allocation7], %s3988_s9, %s3988_s9, %s3989_s10  }
   0x6   :  { %s61_s12 = sshll.u32 %s3990_s11, 4  ;;  %s3991_s13 = smov 128   ;;  %s62_s12 = int_to_ptr.vmem [resolvable:$true] %s61_s12 }
   0x7   :  { %s3992_s14 = smov 8   ;;  %s22_s16 = sshll.u32 %s4124_s1, 4  ;;  %s23_s16 = int_to_ptr.hbm [resolvable:$true] %s22_s16 }
   0x8   :  { %67 = dma.hbm_to_vmem [thread:$0]  %s60_s8, 8192, %s62_s12, [#allocation10], %s3991_s13, %s3991_s13, %s3992_s14  }
   0x9   :  { %s3993_s17 = smov [#allocation4]   ;;  %s49_s20 = sshll.u32 %s4126_s3, 4  ;;  %s50_s20 = int_to_ptr.hbm [resolvable:$true] %s49_s20 }
   0xa   :  { %s24_s18 = sshll.u32 %s3993_s17, 4  ;;  %s3994_s21 = smov 896   ;;  %s25_s18 = int_to_ptr.vmem [resolvable:$true] %s24_s18 }
   0xb   :  { %s3995_s22 = smov 56   ;;  %s3996_s23 = smov [#allocation8]  }
   0xc   :  { %30 = dma.hbm_to_vmem [thread:$0]  %s23_s16, 1792, %s25_s18, [#allocation5], %s3994_s21, %s3994_s21, %s3995_s22  }
   0xd   :  { %s51_s24 = sshll.u32 %s3996_s23, 4  ;;  %s74_s27 = sshll.u32 %s4129_s6, 4  ;;  %s52_s24 = int_to_ptr.vmem [resolvable:$true] %s51_s24  ;;  %s75_s27 = int_to_ptr.hbm [resolvable:$true] %s74_s27 }
   0xe   :  { %54 = dma.hbm_to_vmem [thread:$0]  %s50_s20, 64, %s52_s24, [#allocation7]  }
   0xf   :  { %s3997_s1 = smov [#allocation11]   ;;  %s3998_s29 = smov 64  }
  0x10   :  { %s76_s28 = sshll.u32 %s3997_s1, 4  ;;  %s3999_s30 = smov 4   ;;  %s77_s28 = int_to_ptr.vmem [resolvable:$true] %s76_s28 }
  0x11   :  { %82 = dma.hbm_to_vmem [thread:$0]  %s75_s27, 2048, %s77_s28, [#allocation10], %s3998_s29, %s3998_s29, %s3999_s30  }
  0x12   :  { %3981 = dma.done.wait [#allocation5], 1792  }
  0x13   :  { %3982 = vsyncadd [#allocation5], 4294965504 }
  0x14   :  { %3983 = dma.done.wait [#allocation7], 25152  }
  0x15   :  { %3984 = vsyncadd [#allocation7], 4294942144 }
  0x16   :  { %3985 = dma.done.wait [#allocation10], 10240  }
  0x17   :  { %3986 = vsyncadd [#allocation10], 4294957056  ;;  %v2578_v0 = vld [vmem:[#allocation6 + $0xe0] sm:$0xf]  ;;  %v3602_v1 = vld [vmem:[#allocation6 + $0xec] sm:$0xf0] }
  0x18   :  { %v2706_v2 = vld [vmem:[#allocation6 + $0x1e0] sm:$0xf]  ;;  %v2579_v3 = vor.u32 %v3602_v1, %v2578_v0  ;;  %v3634_v4 = vld [vmem:[#allocation6 + $0x1ec] sm:$0xf0]  ;;  %vm1321_vm0 = vcmask 130048   ;;  %vm2454_vm1 = vcmask 7168  }
  0x19   :  { %v2834_v5 = vld [vmem:[#allocation6 + $0x2e0] sm:$0xf]  ;;  %v3666_v6 = vld [vmem:[#allocation6 + $0x2ec] sm:$0xf0]  ;;  %v2707_v7 = vor.u32 %v3634_v4, %v2706_v2 }
  0x1a   :  { %v2835_v8 = vor.u32 %v3666_v6, %v2834_v5  ;;  %v2962_v9 = vld [vmem:[#allocation6 + $0x3e0] sm:$0xf]  ;;  %v3698_v10 = vld [vmem:[#allocation6 + $0x3ec] sm:$0xf0]  ;;  %1325 = vmatpush.bf16.msra.mxu0 %v2579_v3 }
  0x1b   :  { %v2562_v11 = vld [vmem:[#allocation6 + $0xc0] sm:$0xf]  ;;  %v2963_v12 = vor.u32 %v3698_v10, %v2962_v9  ;;  %v3598_v13 = vld [vmem:[#allocation6 + $0xcc] sm:$0xf0]  ;;  %1339 = vmatpush.bf16.msra.mxu1 %v2707_v7 }
  0x1c   :  { %v2690_v14 = vld [vmem:[#allocation6 + $0x1c0] sm:$0xf]  ;;  %v3630_v15 = vld [vmem:[#allocation6 + $0x1cc] sm:$0xf0]  ;;  %1353 = vmatpush.bf16.msra.mxu2 %v2835_v8  ;;  %v2563_v16 = vor.u32 %v3598_v13, %v2562_v11 }
  0x1d   :  { %v2691_v17 = vor.u32 %v3630_v15, %v2690_v14  ;;  %v2818_v18 = vld [vmem:[#allocation6 + $0x2c0] sm:$0xf]  ;;  %v3662_v19 = vld [vmem:[#allocation6 + $0x2cc] sm:$0xf0]  ;;  %1367 = vmatpush.bf16.msra.mxu3 %v2963_v12 }
  0x1e   :  { %v2946_v20 = vld [vmem:[#allocation6 + $0x3c0] sm:$0xf]  ;;  %v2819_v21 = vor.u32 %v3662_v19, %v2818_v18  ;;  %v3694_v22 = vld [vmem:[#allocation6 + $0x3cc] sm:$0xf0]  ;;  %1326 = vmatpush.bf16.msra.mxu0 %v2563_v16 }
  0x1f   :  { %v2546_v23 = vld [vmem:[#allocation6 + $0xa0] sm:$0xf]  ;;  %v3594_v24 = vld [vmem:[#allocation6 + $0xac] sm:$0xf0]  ;;  %v2947_v25 = vor.u32 %v3694_v22, %v2946_v20  ;;  %1340 = vmatpush.bf16.msra.mxu1 %v2691_v17 }
  0x20   :  { %v2674_v26 = vld [vmem:[#allocation6 + $0x1a0] sm:$0xf]  ;;  %v3626_v27 = vld [vmem:[#allocation6 + $0x1ac] sm:$0xf0]  ;;  %v2547_v29 = vor.u32 %v3594_v24, %v2546_v23  ;;  %1354 = vmatpush.bf16.msra.mxu2 %v2819_v21 }
  0x21   :  { %v2802_v28 = vld [vmem:[#allocation6 + $0x2a0] sm:$0xf]  ;;  %v3658_v30 = vld [vmem:[#allocation6 + $0x2ac] sm:$0xf0]  ;;  %v2675_v33 = vor.u32 %v3626_v27, %v2674_v26  ;;  %1368 = vmatpush.bf16.msra.mxu3 %v2947_v25 }
  0x22   :  { %v2930_v31 = vld [vmem:[#allocation6 + $0x3a0] sm:$0xf]  ;;  %v3690_v32 = vld [vmem:[#allocation6 + $0x3ac] sm:$0xf0]  ;;  %v2803_v34 = vor.u32 %v3658_v30, %v2802_v28  ;;  %1327 = vmatpush.bf16.msra.mxu0 %v2547_v29 }
  0x23   :  { %v2530_v35 = vld [vmem:[#allocation6 + $0x80] sm:$0xf]  ;;  %v3590_v36 = vld [vmem:[#allocation6 + $0x8c] sm:$0xf0]  ;;  %v2931_v38 = vor.u32 %v3690_v32, %v2930_v31  ;;  %1341 = vmatpush.bf16.msra.mxu1 %v2675_v33  ;;  %v3600_v32 = vld [vmem:[#allocation6 + $0xe4] sm:$0xf] }
  0x24   :  { %v2658_v37 = vld [vmem:[#allocation6 + $0x180] sm:$0xf]  ;;  %v3622_v39 = vld [vmem:[#allocation6 + $0x18c] sm:$0xf0]  ;;  %v2531_v44 = vor.u32 %v3590_v36, %v2530_v35  ;;  %1355 = vmatpush.bf16.msra.mxu2 %v2803_v34  ;;  %v2580_v33 = vld [vmem:[#allocation6 + $0xf0] sm:$0xf0] }
  0x25   :  { %v2786_v40 = vld [vmem:[#allocation6 + $0x280] sm:$0xf]  ;;  %v3654_v41 = vld [vmem:[#allocation6 + $0x28c] sm:$0xf0]  ;;  %v2659_v45 = vor.u32 %v3622_v39, %v2658_v37  ;;  %1369 = vmatpush.bf16.msra.mxu3 %v2931_v38  ;;  %v125_v36 = vld [vmem:[#allocation4 + $0x48] sm:$0xff] }
  0x26   :  { %v2914_v42 = vld [vmem:[#allocation6 + $0x380] sm:$0xf]  ;;  %v3686_v43 = vld [vmem:[#allocation6 + $0x38c] sm:$0xf0]  ;;  %v2787_v46 = vor.u32 %v3654_v41, %v2786_v40  ;;  %1328 = vmatpush.bf16.msra.mxu0 %v2531_v44  ;;  %v3632_v41 = vld [vmem:[#allocation6 + $0x1e4] sm:$0xf] }
  0x27   :  { %v2514_v47 = vld [vmem:[#allocation6 + $0x60] sm:$0xf]  ;;  %v3586_v48 = vld [vmem:[#allocation6 + $0x6c] sm:$0xf0]  ;;  %v2915_v50 = vor.u32 %v3686_v43, %v2914_v42  ;;  %1342 = vmatpush.bf16.msra.mxu1 %v2659_v45  ;;  %v123_v43 = vld [vmem:[#allocation4 + $0x38] sm:$0xff] }
  0x28   :  { %v2642_v49 = vld [vmem:[#allocation6 + $0x160] sm:$0xf]  ;;  %v3618_v51 = vld [vmem:[#allocation6 + $0x16c] sm:$0xf0]  ;;  %v2515_v56 = vor.u32 %v3586_v48, %v2514_v47  ;;  %1356 = vmatpush.bf16.msra.mxu2 %v2787_v46  ;;  %v2708_v46 = vld [vmem:[#allocation6 + $0x1f0] sm:$0xf0] }
  0x29   :  { %v2770_v52 = vld [vmem:[#allocation6 + $0x260] sm:$0xf]  ;;  %v3650_v53 = vld [vmem:[#allocation6 + $0x26c] sm:$0xf0]  ;;  %v2643_v57 = vor.u32 %v3618_v51, %v2642_v49  ;;  %1370 = vmatpush.bf16.msra.mxu3 %v2915_v50  ;;  %v119_v47 = vld [vmem:[#allocation4 + $0x18] sm:$0xff]  ;;  %v2583_v50 = vor.u32 %v3600_v32, %v2580_v33 }
  0x2a   :  { %v2898_v54 = vld [vmem:[#allocation6 + $0x360] sm:$0xf]  ;;  %v3682_v55 = vld [vmem:[#allocation6 + $0x36c] sm:$0xf0]  ;;  %v2771_v58 = vor.u32 %v3650_v53, %v2770_v52  ;;  %1329 = vmatpush.bf16.msra.mxu0 %v2515_v56  ;;  %v3596_v56 = vld [vmem:[#allocation6 + $0xc4] sm:$0xf] }
  0x2b   :  { %v2498_v59 = vld [vmem:[#allocation6 + $0x40] sm:$0xf]  ;;  %v3582_v60 = vld [vmem:[#allocation6 + $0x4c] sm:$0xf0]  ;;  %v2899_v62 = vor.u32 %v3682_v55, %v2898_v54  ;;  %1343 = vmatpush.bf16.msra.mxu1 %v2643_v57  ;;  %v2564_v57 = vld [vmem:[#allocation6 + $0xd0] sm:$0xf0] }
  0x2c   :  { %v2626_v61 = vld [vmem:[#allocation6 + $0x140] sm:$0xf]  ;;  %v3614_v63 = vld [vmem:[#allocation6 + $0x14c] sm:$0xf0]  ;;  %v2499_v4 = vor.u32 %v3582_v60, %v2498_v59  ;;  %1357 = vmatpush.bf16.msra.mxu2 %v2771_v58 }
  0x2d   :  { %v2754_v0 = vld [vmem:[#allocation6 + $0x240] sm:$0xf]  ;;  %v3646_v1 = vld [vmem:[#allocation6 + $0x24c] sm:$0xf0]  ;;  %v2627_v6 = vor.u32 %v3614_v63, %v2626_v61  ;;  %1371 = vmatpush.bf16.msra.mxu3 %v2899_v62  ;;  %v117_v61 = vld [vmem:[#allocation4 + $0x8] sm:$0xff]  ;;  %v2711_v63 = vor.u32 %v3632_v41, %v2708_v46 }
  0x2e   :  { %v2882_v2 = vld [vmem:[#allocation6 + $0x340] sm:$0xf]  ;;  %v3678_v3 = vld [vmem:[#allocation6 + $0x34c] sm:$0xf0]  ;;  %v2755_v7 = vor.u32 %v3646_v1, %v2754_v0  ;;  %1330 = vmatpush.bf16.msra.mxu0 %v2499_v4  ;;  %v3628_v1 = vld [vmem:[#allocation6 + $0x1c4] sm:$0xf]  ;;  %v2567_v4 = vor.u32 %v3596_v56, %v2564_v57 }
  0x2f   :  { %v2482_v5 = vld [vmem:[#allocation6 + $0x20] sm:$0xf]  ;;  %v3578_v8 = vld [vmem:[#allocation6 + $0x2c] sm:$0xf0]  ;;  %v2883_v11 = vor.u32 %v3678_v3, %v2882_v2  ;;  %1344 = vmatpush.bf16.msra.mxu1 %v2627_v6  ;;  %v2692_v2 = vld [vmem:[#allocation6 + $0x1d0] sm:$0xf0] }
  0x30   :  { %v2610_v9 = vld [vmem:[#allocation6 + $0x120] sm:$0xf]  ;;  %v3610_v10 = vld [vmem:[#allocation6 + $0x12c] sm:$0xf0]  ;;  %v2483_v18 = vor.u32 %v3578_v8, %v2482_v5  ;;  %1358 = vmatpush.bf16.msra.mxu2 %v2755_v7  ;;  %v2644_v41 = vld [vmem:[#allocation6 + $0x170] sm:$0xf0] }
  0x31   :  { %v2738_v12 = vld [vmem:[#allocation6 + $0x220] sm:$0xf]  ;;  %v3642_v13 = vld [vmem:[#allocation6 + $0x22c] sm:$0xf0]  ;;  %v2611_v23 = vor.u32 %v3610_v10, %v2610_v9  ;;  %1372 = vmatpush.bf16.msra.mxu3 %v2883_v11  ;;  %v3592_v10 = vld [vmem:[#allocation6 + $0xa4] sm:$0xf] }
  0x32   :  { %v2866_v14 = vld [vmem:[#allocation6 + $0x320] sm:$0xf]  ;;  %v3674_v15 = vld [vmem:[#allocation6 + $0x32c] sm:$0xf0]  ;;  %v2739_v24 = vor.u32 %v3642_v13, %v2738_v12  ;;  %1331 = vmatpush.bf16.msra.mxu0 %v2483_v18  ;;  %v2548_v11 = vld [vmem:[#allocation6 + $0xb0] sm:$0xf0]  ;;  %v2695_v12 = vor.u32 %v3628_v1, %v2692_v2 }
  0x33   :  { %v2466_v16 = vld [vmem:[#allocation6] sm:$0xf]  ;;  %v3574_v17 = vld [vmem:[#allocation6 + $0xc] sm:$0xf0]  ;;  %v2867_v28 = vor.u32 %v3674_v15, %v2866_v14  ;;  %1345 = vmatpush.bf16.msra.mxu1 %v2611_v23  ;;  %v3624_v14 = vld [vmem:[#allocation6 + $0x1a4] sm:$0xf] }
  0x34   :  { %v2594_v19 = vld [vmem:[#allocation6 + $0x100] sm:$0xf]  ;;  %v3606_v20 = vld [vmem:[#allocation6 + $0x10c] sm:$0xf0]  ;;  %v2467_v35 = vor.u32 %v3574_v17, %v2466_v16  ;;  %1359 = vmatpush.bf16.msra.mxu2 %v2739_v24  ;;  %v2676_v15 = vld [vmem:[#allocation6 + $0x1b0] sm:$0xf0]  ;;  %v2551_v17 = vor.u32 %v3592_v10, %v2548_v11 }
  0x35   :  { %v2722_v21 = vld [vmem:[#allocation6 + $0x200] sm:$0xf]  ;;  %v3638_v22 = vld [vmem:[#allocation6 + $0x20c] sm:$0xf0]  ;;  %v2595_v39 = vor.u32 %v3606_v20, %v2594_v19  ;;  %1373 = vmatpush.bf16.msra.mxu3 %v2867_v28  ;;  %v2532_v23 = vld [vmem:[#allocation6 + $0x90] sm:$0xf0]  ;;  %v2679_v24 = vor.u32 %v3624_v14, %v2676_v15 }
  0x36   :  { %v2850_v25 = vld [vmem:[#allocation6 + $0x300] sm:$0xf]  ;;  %v3670_v26 = vld [vmem:[#allocation6 + $0x30c] sm:$0xf0]  ;;  %v2723_v40 = vor.u32 %v3638_v22, %v2722_v21  ;;  %1332 = vmatpush.bf16.msra.mxu0 %v2467_v35  ;;  %v3588_v22 = vld [vmem:[#allocation6 + $0x84] sm:$0xf] }
  0x37   :  { %v3090_v27 = vld [vmem:[#allocation6 + $0x4e0] sm:$0xf]  ;;  %v3730_v29 = vld [vmem:[#allocation6 + $0x4ec] sm:$0xf0]  ;;  %v2851_v44 = vor.u32 %v3670_v26, %v2850_v25  ;;  %1346 = vmatpush.bf16.msra.mxu1 %v2595_v39  ;;  %v3620_v26 = vld [vmem:[#allocation6 + $0x184] sm:$0xf] }
  0x38   :  { %v3218_v30 = vld [vmem:[#allocation6 + $0x5e0] sm:$0xf]  ;;  %v3762_v31 = vld [vmem:[#allocation6 + $0x5ec] sm:$0xf0]  ;;  %v3091_v45 = vor.u32 %v3730_v29, %v3090_v27  ;;  %1360 = vmatpush.bf16.msra.mxu2 %v2723_v40  ;;  %v2660_v27 = vld [vmem:[#allocation6 + $0x190] sm:$0xf0]  ;;  %v2535_v29 = vor.u32 %v3588_v22, %v2532_v23 }
  0x39   :  { %v118_v34 = vld [vmem:[#allocation4 + $0x10] sm:$0xff]  ;;  %v3766_v38 = vld [vmem:[#allocation6 + $0x60c] sm:$0xf0]  ;;  %v3219_v49 = vor.u32 %v3762_v31, %v3218_v30  ;;  %1374 = vmatpush.bf16.msra.mxu3 %v2851_v44  ;;  %v2516_v35 = vld [vmem:[#allocation6 + $0x70] sm:$0xf0] }
  0x3a   :  { %v3234_v37 = vld [vmem:[#allocation6 + $0x600] sm:$0xf]  ;;  %v116_v42 = vld [vmem:[#allocation4] sm:$0xff]  ;;  %v4055_v54 = vpack.c.bf16 %v125_v36, %v118_v34  ;;  %1381 = vmatpush.bf16.msrb.mxu0 %v3091_v45  ;;  %v3584_v34 = vld [vmem:[#allocation6 + $0x64] sm:$0xf] }
  0x3b   :  { %v126_v48 = vld [vmem:[#allocation4 + $0x50] sm:$0xff]  ;;  %v3726_v52 = vld [vmem:[#allocation6 + $0x4cc] sm:$0xf0]  ;;  %v4057_v58 = vpack.c.bf16 %v123_v43, %v116_v42  ;;  %v3235_v59 = vor.u32 %v3766_v38, %v3234_v37  ;;  %1395 = vmatpush.bf16.msrb.mxu1 %v3219_v49  ;;  %v129_v37 = vld [vmem:[#allocation4 + $0x68] sm:$0xff]  ;;  %v2663_v38 = vor.u32 %v3620_v26, %v2660_v27  ;;  %v2519_v43 = vor.u32 %v3584_v34, %v2516_v35 }
  0x3c   :  { %v3074_v51 = vld [vmem:[#allocation6 + $0x4c0] sm:$0xf]  ;;  %v3758_v55 = vld [vmem:[#allocation6 + $0x5cc] sm:$0xf0]  ;;  %v4059_v60 = vpack.c.bf16 %v126_v48, %v119_v47  ;;  %1361 = vmatmul.bf16.vlgmr.msra.gmra.mxu2 %v4055_v54  ;;  %v3616_v40 = vld [vmem:[#allocation6 + $0x164] sm:$0xf] }
  0x3d   :  { %v3202_v53 = vld [vmem:[#allocation6 + $0x5c0] sm:$0xf]  ;;  %v124_v62 = vld [vmem:[#allocation4 + $0x40] sm:$0xff]  ;;  %v3075_v0 = vor.u32 %v3726_v52, %v3074_v51  ;;  %1423 = vmatpush.bf16.msrb.mxu3 %v2583_v50  ;;  %1333 = vmatmul.bf16.vlgmr.msra.gmra.mxu0 %v4057_v58  ;;  %v3580_v48 = vld [vmem:[#allocation6 + $0x44] sm:$0xf]  ;;  %v2647_v51 = vor.u32 %v3616_v40, %v2644_v41 }
  0x3e   :  { %v3203_v3 = vor.u32 %v3758_v55, %v3202_v53  ;;  %v3058_v5 = vld [vmem:[#allocation6 + $0x4a0] sm:$0xf]  ;;  %v3722_v6 = vld [vmem:[#allocation6 + $0x4ac] sm:$0xf0]  ;;  %v4063_v8 = vpack.c.bf16 %v124_v62, %v117_v61  ;;  %1416 = vmatpush.bf16.msrb.mxu2 %v3235_v59  ;;  %1375 = vmatmul.bf16.vlgmr.msra.gmra.mxu3 %v4059_v60  ;;  %v2500_v49 = vld [vmem:[#allocation6 + $0x50] sm:$0xf0] }
  0x3f   :  { %v3186_v7 = vld [vmem:[#allocation6 + $0x5a0] sm:$0xf]  ;;  %v3754_v9 = vld [vmem:[#allocation6 + $0x5ac] sm:$0xf0]  ;;  %1382 = vmatpush.bf16.msrb.mxu0 %v3075_v0  ;;  %v3059_v13 = vor.u32 %v3722_v6, %v3058_v5  ;;  %v3612_v53 = vld [vmem:[#allocation6 + $0x144] sm:$0xf]  ;;  %v2503_v57 = vor.u32 %v3580_v48, %v2500_v49 }
  0x40   :  { %1396 = vmatpush.bf16.msrb.mxu1 %v3203_v3  ;;  %v3187_v16 = vor.u32 %v3754_v9, %v3186_v7  ;;  %v3042_v18 = vld [vmem:[#allocation6 + $0x480] sm:$0xf]  ;;  %v3718_v19 = vld [vmem:[#allocation6 + $0x48c] sm:$0xf0]  ;;  %v2628_v55 = vld [vmem:[#allocation6 + $0x150] sm:$0xf0] }
  0x41   :  { %1424 = vmatpush.bf16.msrb.mxu3 %v2567_v4  ;;  %v3170_v20 = vld [vmem:[#allocation6 + $0x580] sm:$0xf]  ;;  %1347 = vmatmul.bf16.vlgmr.msra.gmra.mxu1 %v4063_v8  ;;  %v3750_v21 = vld [vmem:[#allocation6 + $0x58c] sm:$0xf0]  ;;  %v3043_v25 = vor.u32 %v3718_v19, %v3042_v18  ;;  %v3576_v0 = vld [vmem:[#allocation6 + $0x24] sm:$0xf]  ;;  %v2631_v4 = vor.u32 %v3612_v53, %v2628_v55 }
  0x42   :  { %1437 = vmatpush.bf16.msra.mxu2 %v2711_v63  ;;  %v3171_v28 = vor.u32 %v3750_v21, %v3170_v20  ;;  %v3026_v30 = vld [vmem:[#allocation6 + $0x460] sm:$0xf]  ;;  %v3714_v31 = vld [vmem:[#allocation6 + $0x46c] sm:$0xf0]  ;;  %v2484_v1 = vld [vmem:[#allocation6 + $0x30] sm:$0xf0] }
  0x43   :  { %1383 = vmatpush.bf16.msrb.mxu0 %v3059_v13  ;;  %v3154_v32 = vld [vmem:[#allocation6 + $0x560] sm:$0xf]  ;;  %v3746_v33 = vld [vmem:[#allocation6 + $0x56c] sm:$0xf0]  ;;  %v3027_v39 = vor.u32 %v3714_v31, %v3026_v30  ;;  %v3608_v2 = vld [vmem:[#allocation6 + $0x124] sm:$0xf]  ;;  %v2487_v11 = vor.u32 %v3576_v0, %v2484_v1 }
  0x44   :  { %1397 = vmatpush.bf16.msrb.mxu1 %v3187_v16  ;;  %v122_v36 = vld [vmem:[#allocation4 + $0x30] sm:$0xff]  ;;  %v3155_v42 = vor.u32 %v3746_v33, %v3154_v32  ;;  %v3710_v45 = vld [vmem:[#allocation6 + $0x44c] sm:$0xf0]  ;;  %v2612_v3 = vld [vmem:[#allocation6 + $0x130] sm:$0xf0] }
  0x45   :  { %1425 = vmatpush.bf16.msrb.mxu3 %v2551_v17  ;;  %v3010_v44 = vld [vmem:[#allocation6 + $0x440] sm:$0xf]  ;;  %v3742_v47 = vld [vmem:[#allocation6 + $0x54c] sm:$0xf0]  ;;  %v4067_v50 = vpack.c.bf16 %v129_v37, %v122_v36  ;;  %v3572_v13 = vld [vmem:[#allocation6 + $0x4] sm:$0xf]  ;;  %v2615_v21 = vor.u32 %v3608_v2, %v2612_v3 }
  0x46   :  { %1438 = vmatpush.bf16.msra.mxu2 %v2695_v12  ;;  %v3138_v46 = vld [vmem:[#allocation6 + $0x540] sm:$0xf]  ;;  %v3011_v52 = vor.u32 %v3710_v45, %v3010_v44  ;;  %v3706_v61 = vld [vmem:[#allocation6 + $0x42c] sm:$0xf0]  ;;  %v2468_v14 = vld [vmem:[#allocation6 + $0x10] sm:$0xf0] }
  0x47   :  { %1384 = vmatpush.bf16.msrb.mxu0 %v3043_v25  ;;  %v3139_v56 = vor.u32 %v3742_v47, %v3138_v46  ;;  %v2994_v59 = vld [vmem:[#allocation6 + $0x420] sm:$0xf]  ;;  %v3738_v63 = vld [vmem:[#allocation6 + $0x52c] sm:$0xf0]  ;;  %v3664_v15 = vld [vmem:[#allocation6 + $0x2e4] sm:$0xf]  ;;  %v2471_v27 = vor.u32 %v3572_v13, %v2468_v14 }
  0x48   :  { %1398 = vmatpush.bf16.msrb.mxu1 %v3171_v28  ;;  %v3122_v62 = vld [vmem:[#allocation6 + $0x520] sm:$0xf]  ;;  %v2995_v5 = vor.u32 %v3706_v61, %v2994_v59  ;;  %v3702_v7 = vld [vmem:[#allocation6 + $0x40c] sm:$0xf0]  ;;  %v2836_v16 = vld [vmem:[#allocation6 + $0x2f0] sm:$0xf0] }
  0x49   :  { %1426 = vmatpush.bf16.msrb.mxu3 %v2535_v29  ;;  %v2978_v6 = vld [vmem:[#allocation6 + $0x400] sm:$0xf]  ;;  %v3123_v10 = vor.u32 %v3738_v63, %v3122_v62  ;;  %v3734_v12 = vld [vmem:[#allocation6 + $0x50c] sm:$0xf0]  ;;  %v3696_v17 = vld [vmem:[#allocation6 + $0x3e4] sm:$0xf]  ;;  %v2839_v31 = vor.u32 %v3664_v15, %v2836_v16 }
  0x4a   :  { %1439 = vmatpush.bf16.msra.mxu2 %v2679_v24  ;;  %v3106_v9 = vld [vmem:[#allocation6 + $0x500] sm:$0xf]  ;;  %v2964_v18 = vld [vmem:[#allocation6 + $0x3f0] sm:$0xf0]  ;;  %v3728_v19 = vld [vmem:[#allocation6 + $0x4e4] sm:$0xf]  ;;  %v2979_v22 = vor.u32 %v3702_v7, %v2978_v6 }
  0x4b   :  { %1385 = vmatpush.bf16.msrb.mxu0 %v3027_v39  ;;  %v3092_v20 = vld [vmem:[#allocation6 + $0x4f0] sm:$0xf0]  ;;  %v127_v24 = vld [vmem:[#allocation4 + $0x58] sm:$0xff]  ;;  %v3604_v25 = vld [vmem:[#allocation6 + $0x104] sm:$0xf]  ;;  %v3107_v26 = vor.u32 %v3734_v12, %v3106_v9  ;;  %v2967_v32 = vor.u32 %v3696_v17, %v2964_v18 }
  0x4c   :  { %1399 = vmatpush.bf16.msrb.mxu1 %v3155_v42  ;;  %3248 = vmatmul.msk.bf16.vlgmr.msrb.gmra.mxu2 %vm1321_vm0, %v4067_v50  ;;  %v120_v23 = vld [vmem:[#allocation4 + $0x20] sm:$0xff]  ;;  %v121_v29 = vld [vmem:[#allocation4 + $0x28] sm:$0xff]  ;;  %v3760_v33 = vld [vmem:[#allocation6 + $0x5e4] sm:$0xf]  ;;  %v3095_v36 = vor.u32 %v3728_v19, %v3092_v20 }
  0x4d   :  { %1427 = vmatpush.bf16.msrb.mxu3 %v2519_v43  ;;  %v2596_v28 = vld [vmem:[#allocation6 + $0x110] sm:$0xf0]  ;;  %v3660_v35 = vld [vmem:[#allocation6 + $0x2c4] sm:$0xf]  ;;  %v4071_v37 = vpack.c.bf16 %v127_v24, %v120_v23 }
  0x4e   :  { %1440 = vmatpush.bf16.msra.mxu2 %v2663_v38  ;;  %v128_v30 = vld [vmem:[#allocation4 + $0x60] sm:$0xff]  ;;  %v3692_v39 = vld [vmem:[#allocation6 + $0x3c4] sm:$0xf]  ;;  %v2599_v41 = vor.u32 %v3604_v25, %v2596_v28 }
  0x4f   :  { %1386 = vmatpush.bf16.msrb.mxu0 %v3011_v52  ;;  %v3220_v34 = vld [vmem:[#allocation6 + $0x5f0] sm:$0xf0]  ;;  %v4073_v42 = vpack.c.bf16 %v128_v30, %v121_v29  ;;  %v3724_v43 = vld [vmem:[#allocation6 + $0x4c4] sm:$0xf] }
  0x50   :  { %1400 = vmatpush.bf16.msrb.mxu1 %v3139_v56  ;;  %v2820_v38 = vld [vmem:[#allocation6 + $0x2d0] sm:$0xf0]  ;;  %v3223_v45 = vor.u32 %v3760_v33, %v3220_v34  ;;  %v3756_v48 = vld [vmem:[#allocation6 + $0x5c4] sm:$0xf] }
  0x51   :  { %1428 = vmatpush.bf16.msrb.mxu3 %v2503_v57  ;;  %v2948_v40 = vld [vmem:[#allocation6 + $0x3d0] sm:$0xf0]  ;;  %v2823_v46 = vor.u32 %v3660_v35, %v2820_v38  ;;  %v3688_v55 = vld [vmem:[#allocation6 + $0x3a4] sm:$0xf] }
  0x52   :  { %1441 = vmatpush.bf16.msra.mxu2 %v2647_v51  ;;  %v3076_v44 = vld [vmem:[#allocation6 + $0x4d0] sm:$0xf0]  ;;  %v2951_v47 = vor.u32 %v3692_v39, %v2948_v40  ;;  %v3656_v51 = vld [vmem:[#allocation6 + $0x2a4] sm:$0xf] }
  0x53   :  { %1387 = vmatpush.bf16.msrb.mxu0 %v2995_v5  ;;  %v3204_v49 = vld [vmem:[#allocation6 + $0x5d0] sm:$0xf0]  ;;  %v3079_v52 = vor.u32 %v3724_v43, %v3076_v44  ;;  %v3720_v57 = vld [vmem:[#allocation6 + $0x4a4] sm:$0xf] }
  0x54   :  { %1401 = vmatpush.bf16.msrb.mxu1 %v3123_v10  ;;  %v2804_v53 = vld [vmem:[#allocation6 + $0x2b0] sm:$0xf0]  ;;  %v3207_v61 = vor.u32 %v3756_v48, %v3204_v49  ;;  %v3752_v0 = vld [vmem:[#allocation6 + $0x5a4] sm:$0xf] }
  0x55   :  { %1429 = vmatpush.bf16.msrb.mxu3 %v2487_v11  ;;  %v2932_v56 = vld [vmem:[#allocation6 + $0x3b0] sm:$0xf0]  ;;  %v2807_v62 = vor.u32 %v3656_v51, %v2804_v53  ;;  %v3652_v2 = vld [vmem:[#allocation6 + $0x284] sm:$0xf] }
  0x56   :  { %1442 = vmatpush.bf16.msra.mxu2 %v2631_v4  ;;  %v3060_v59 = vld [vmem:[#allocation6 + $0x4b0] sm:$0xf0]  ;;  %v2935_v63 = vor.u32 %v3688_v55, %v2932_v56  ;;  %v3684_v5 = vld [vmem:[#allocation6 + $0x384] sm:$0xf] }
  0x57   :  { %1388 = vmatpush.bf16.msrb.mxu0 %v2979_v22  ;;  %v3188_v1 = vld [vmem:[#allocation6 + $0x5b0] sm:$0xf0]  ;;  %v3063_v3 = vor.u32 %v3720_v57, %v3060_v59  ;;  %v3716_v7 = vld [vmem:[#allocation6 + $0x484] sm:$0xf] }
  0x58   :  { %1402 = vmatpush.bf16.msrb.mxu1 %v3107_v26  ;;  %v2788_v4 = vld [vmem:[#allocation6 + $0x290] sm:$0xf0]  ;;  %v3191_v10 = vor.u32 %v3752_v0, %v3188_v1  ;;  %v3748_v13 = vld [vmem:[#allocation6 + $0x584] sm:$0xf]  ;;  %v2586_v0 = vld [vmem:[#allocation6 + $0xe8] sm:$0xf] }
  0x59   :  { %1430 = vmatpush.bf16.msrb.mxu3 %v2471_v27  ;;  %v2916_v6 = vld [vmem:[#allocation6 + $0x390] sm:$0xf0]  ;;  %v2791_v11 = vor.u32 %v3652_v2, %v2788_v4  ;;  %v3648_v15 = vld [vmem:[#allocation6 + $0x264] sm:$0xf]  ;;  %v3603_v1 = vld [vmem:[#allocation6 + $0xf4] sm:$0xf0] }
  0x5a   :  { %1443 = vmatpush.bf16.msra.mxu2 %v2615_v21  ;;  %1389 = vmatmul.bf16.vlgmr.msrb.gmra.mxu0 %v4071_v37  ;;  %v3044_v9 = vld [vmem:[#allocation6 + $0x490] sm:$0xf0]  ;;  %v2919_v12 = vor.u32 %v3684_v5, %v2916_v6  ;;  %v3680_v18 = vld [vmem:[#allocation6 + $0x364] sm:$0xf]  ;;  %v2714_v2 = vld [vmem:[#allocation6 + $0x1e8] sm:$0xf] }
  0x5b   :  { %1451 = vmatpush.bf16.msra.mxu0 %v2839_v31  ;;  %1403 = vmatmul.bf16.vlgmr.msrb.gmra.mxu1 %v4073_v42  ;;  %v3172_v14 = vld [vmem:[#allocation6 + $0x590] sm:$0xf0]  ;;  %v3047_v16 = vor.u32 %v3716_v7, %v3044_v9  ;;  %v3712_v20 = vld [vmem:[#allocation6 + $0x464] sm:$0xf]  ;;  %v3635_v4 = vld [vmem:[#allocation6 + $0x1f4] sm:$0xf0] }
  0x5c   :  { %1465 = vmatpush.bf16.msra.mxu1 %v2967_v32  ;;  %1431 = vmatmul.bf16.vlgmr.msrb.gmra.mxu3 %v4057_v58  ;;  %v2772_v17 = vld [vmem:[#allocation6 + $0x270] sm:$0xf0]  ;;  %v3175_v22 = vor.u32 %v3748_v13, %v3172_v14  ;;  %v3744_v25 = vld [vmem:[#allocation6 + $0x564] sm:$0xf]  ;;  %v2587_v13 = vor.u32 %v3603_v1, %v2586_v0  ;;  %v2970_v14 = vld [vmem:[#allocation6 + $0x3e8] sm:$0xf] }
  0x5d   :  { %1479 = vmatpush.bf16.msra.mxu3 %v3095_v36  ;;  %v2900_v19 = vld [vmem:[#allocation6 + $0x370] sm:$0xf0]  ;;  %v2775_v23 = vor.u32 %v3648_v15, %v2772_v17  ;;  %v3644_v27 = vld [vmem:[#allocation6 + $0x244] sm:$0xf]  ;;  %v3699_v15 = vld [vmem:[#allocation6 + $0x3f4] sm:$0xf0]  ;;  %v2715_v17 = vor.u32 %v3635_v4, %v2714_v2 }
  0x5e   :  { %1444 = vmatpush.bf16.msra.mxu2 %v2599_v41  ;;  %v3028_v21 = vld [vmem:[#allocation6 + $0x470] sm:$0xf0]  ;;  %v2903_v24 = vor.u32 %v3680_v18, %v2900_v19  ;;  %v3676_v30 = vld [vmem:[#allocation6 + $0x344] sm:$0xf]  ;;  %v3599_v18 = vld [vmem:[#allocation6 + $0xd4] sm:$0xf0] }
  0x5f   :  { %1452 = vmatpush.bf16.msra.mxu0 %v2823_v46  ;;  %v3156_v26 = vld [vmem:[#allocation6 + $0x570] sm:$0xf0]  ;;  %v3031_v28 = vor.u32 %v3712_v20, %v3028_v21  ;;  %v3708_v32 = vld [vmem:[#allocation6 + $0x444] sm:$0xf]  ;;  %v2842_v20 = vld [vmem:[#allocation6 + $0x2e8] sm:$0xf] }
  0x60   :  { %1466 = vmatpush.bf16.msra.mxu1 %v2951_v47  ;;  %v2756_v29 = vld [vmem:[#allocation6 + $0x250] sm:$0xf0]  ;;  %v3159_v34 = vor.u32 %v3744_v25, %v3156_v26  ;;  %v3740_v38 = vld [vmem:[#allocation6 + $0x544] sm:$0xf]  ;;  %v3667_v21 = vld [vmem:[#allocation6 + $0x2f4] sm:$0xf0]  ;;  %v2971_v25 = vor.u32 %v3699_v15, %v2970_v14 }
  0x61   :  { %1480 = vmatpush.bf16.msra.mxu3 %v3079_v52  ;;  %1445 = vmatmul.bf16.vlgmr.msra.gmra.mxu2 %v4063_v8  ;;  %v2884_v31 = vld [vmem:[#allocation6 + $0x350] sm:$0xf0]  ;;  %v2759_v35 = vor.u32 %v3644_v27, %v2756_v29  ;;  %v3640_v40 = vld [vmem:[#allocation6 + $0x224] sm:$0xf]  ;;  %v2954_v27 = vld [vmem:[#allocation6 + $0x3c8] sm:$0xf] }
  0x62   :  { %1493 = vmatpush.bf16.msrb.mxu2 %v3223_v45  ;;  %v3012_v33 = vld [vmem:[#allocation6 + $0x450] sm:$0xf0]  ;;  %v2887_v36 = vor.u32 %v3676_v30, %v2884_v31  ;;  %v3672_v44 = vld [vmem:[#allocation6 + $0x324] sm:$0xf]  ;;  %v2554_v29 = vld [vmem:[#allocation6 + $0xa8] sm:$0xf]  ;;  %v2843_v30 = vor.u32 %v3667_v21, %v2842_v20 }
  0x63   :  { %1453 = vmatpush.bf16.msra.mxu0 %v2807_v62  ;;  %v3140_v39 = vld [vmem:[#allocation6 + $0x550] sm:$0xf0]  ;;  %v3015_v41 = vor.u32 %v3708_v32, %v3012_v33  ;;  %v3704_v46 = vld [vmem:[#allocation6 + $0x424] sm:$0xf]  ;;  %v3595_v32 = vld [vmem:[#allocation6 + $0xb4] sm:$0xf0] }
  0x64   :  { %1467 = vmatpush.bf16.msra.mxu1 %v2935_v63  ;;  %v2740_v43 = vld [vmem:[#allocation6 + $0x230] sm:$0xf0]  ;;  %v3143_v48 = vor.u32 %v3740_v38, %v3140_v39  ;;  %v3736_v49 = vld [vmem:[#allocation6 + $0x524] sm:$0xf]  ;;  %v2826_v33 = vld [vmem:[#allocation6 + $0x2c8] sm:$0xf]  ;;  %v2555_v39 = vor.u32 %v3595_v32, %v2554_v29 }
  0x65   :  { %1481 = vmatpush.bf16.msra.mxu3 %v3063_v3  ;;  %v2868_v45 = vld [vmem:[#allocation6 + $0x330] sm:$0xf0]  ;;  %v2743_v52 = vor.u32 %v3640_v40, %v2740_v43  ;;  %v3636_v55 = vld [vmem:[#allocation6 + $0x204] sm:$0xf]  ;;  %v2938_v40 = vld [vmem:[#allocation6 + $0x3a8] sm:$0xf] }
  0x66   :  { %1494 = vmatpush.bf16.msrb.mxu2 %v3207_v61  ;;  %v2996_v47 = vld [vmem:[#allocation6 + $0x430] sm:$0xf0]  ;;  %v2871_v53 = vor.u32 %v3672_v44, %v2868_v45  ;;  %v3668_v57 = vld [vmem:[#allocation6 + $0x304] sm:$0xf]  ;;  %v2538_v43 = vld [vmem:[#allocation6 + $0x88] sm:$0xf] }
  0x67   :  { %1454 = vmatpush.bf16.msra.mxu0 %v2791_v11  ;;  %v3124_v51 = vld [vmem:[#allocation6 + $0x530] sm:$0xf0]  ;;  %v2999_v59 = vor.u32 %v3704_v46, %v2996_v47  ;;  %v3700_v62 = vld [vmem:[#allocation6 + $0x404] sm:$0xf]  ;;  %v3591_v46 = vld [vmem:[#allocation6 + $0x94] sm:$0xf0] }
  0x68   :  { %1468 = vmatpush.bf16.msra.mxu1 %v2919_v12  ;;  %v2724_v56 = vld [vmem:[#allocation6 + $0x210] sm:$0xf0]  ;;  %v3127_v3 = vor.u32 %v3736_v49, %v3124_v51  ;;  %v3764_v5 = vld [vmem:[#allocation6 + $0x604] sm:$0xf]  ;;  %v2810_v47 = vld [vmem:[#allocation6 + $0x2a8] sm:$0xf] }
  0x69   :  { %1482 = vmatpush.bf16.msra.mxu3 %v3047_v16  ;;  %v2852_v61 = vld [vmem:[#allocation6 + $0x310] sm:$0xf0]  ;;  %v2727_v7 = vor.u32 %v3636_v55, %v2724_v56  ;;  %v2570_v16 = vld [vmem:[#allocation6 + $0xc8] sm:$0xf]  ;;  %v3623_v51 = vld [vmem:[#allocation6 + $0x194] sm:$0xf0] }
  0x6a   :  { %1495 = vmatpush.bf16.msrb.mxu2 %v3191_v10  ;;  %v2980_v63 = vld [vmem:[#allocation6 + $0x410] sm:$0xf0]  ;;  %v2855_v9 = vor.u32 %v3668_v57, %v2852_v61  ;;  %v3732_v10 = vld [vmem:[#allocation6 + $0x504] sm:$0xf]  ;;  %v2571_v26 = vor.u32 %v3599_v18, %v2570_v16  ;;  %v2666_v49 = vld [vmem:[#allocation6 + $0x188] sm:$0xf] }
  0x6b   :  { %1455 = vmatpush.bf16.msra.mxu0 %v2775_v23  ;;  %v3236_v6 = vld [vmem:[#allocation6 + $0x610] sm:$0xf0]  ;;  %v2983_v12 = vor.u32 %v3700_v62, %v2980_v63  ;;  %v2698_v23 = vld [vmem:[#allocation6 + $0x1c8] sm:$0xf]  ;;  %v3687_v56 = vld [vmem:[#allocation6 + $0x394] sm:$0xf0]  ;;  %v2667_v61 = vor.u32 %v3623_v51, %v2666_v49 }
  0x6c   :  { %1469 = vmatpush.bf16.msra.mxu1 %v2903_v24  ;;  %v3108_v11 = vld [vmem:[#allocation6 + $0x510] sm:$0xf0]  ;;  %v3239_v19 = vor.u32 %v3764_v5, %v3236_v6  ;;  %v3631_v24 = vld [vmem:[#allocation6 + $0x1d4] sm:$0xf0]  ;;  %v2922_v55 = vld [vmem:[#allocation6 + $0x388] sm:$0xf] }
  0x6d   :  { %1483 = vmatpush.bf16.msra.mxu3 %v3031_v28  ;;  %v3695_v28 = vld [vmem:[#allocation6 + $0x3d4] sm:$0xf0]  ;;  %v2699_v31 = vor.u32 %v3631_v24, %v2698_v23  ;;  %v2522_v57 = vld [vmem:[#allocation6 + $0x68] sm:$0xf] }
  0x6e   :  { %1496 = vmatpush.bf16.msrb.mxu2 %v3175_v22  ;;  %v3111_v22 = vor.u32 %v3732_v10, %v3108_v11  ;;  %v2955_v38 = vor.u32 %v3695_v28, %v2954_v27  ;;  %v3587_v62 = vld [vmem:[#allocation6 + $0x74] sm:$0xf0]  ;;  %v2794_v63 = vld [vmem:[#allocation6 + $0x288] sm:$0xf] }
  0x6f   :  { %1456 = vmatpush.bf16.msra.mxu0 %v2759_v35  ;;  %v2682_v35 = vld [vmem:[#allocation6 + $0x1a8] sm:$0xf]  ;;  %v3655_v0 = vld [vmem:[#allocation6 + $0x294] sm:$0xf0]  ;;  %v2523_v4 = vor.u32 %v3587_v62, %v2522_v57 }
  0x70   :  { %1470 = vmatpush.bf16.msra.mxu1 %v2887_v36  ;;  %v3627_v36 = vld [vmem:[#allocation6 + $0x1b4] sm:$0xf0]  ;;  %v2650_v1 = vld [vmem:[#allocation6 + $0x168] sm:$0xf] }
  0x71   :  { %1484 = vmatpush.bf16.msra.mxu3 %v3015_v41  ;;  %v3691_v41 = vld [vmem:[#allocation6 + $0x3b4] sm:$0xf0]  ;;  %v2683_v45 = vor.u32 %v3627_v36, %v2682_v35  ;;  %v2906_v5 = vld [vmem:[#allocation6 + $0x368] sm:$0xf] }
  0x72   :  { %1497 = vmatpush.bf16.msrb.mxu2 %v3159_v34  ;;  %v3663_v34 = vld [vmem:[#allocation6 + $0x2d4] sm:$0xf0]  ;;  %v2634_v14 = vld [vmem:[#allocation6 + $0x148] sm:$0xf] }
  0x73   :  { %1457 = vmatpush.bf16.msra.mxu0 %v2743_v52  ;;  %v2827_v44 = vor.u32 %v3663_v34, %v2826_v33  ;;  %v2939_v52 = vor.u32 %v3691_v41, %v2938_v40  ;;  %v3619_v2 = vld [vmem:[#allocation6 + $0x174] sm:$0xf0]  ;;  %v2890_v18 = vld [vmem:[#allocation6 + $0x348] sm:$0xf] }
  0x74   :  { %1471 = vmatpush.bf16.msra.mxu1 %v2871_v53  ;;  %v2539_v53 = vor.u32 %v3591_v46, %v2538_v43  ;;  %v3683_v6 = vld [vmem:[#allocation6 + $0x374] sm:$0xf0]  ;;  %v2651_v10 = vor.u32 %v3619_v2, %v2650_v1  ;;  %v2490_v20 = vld [vmem:[#allocation6 + $0x28] sm:$0xf] }
  0x75   :  { %1485 = vmatpush.bf16.msra.mxu3 %v2999_v59  ;;  %v3583_v11 = vld [vmem:[#allocation6 + $0x54] sm:$0xf0]  ;;  %v2907_v16 = vor.u32 %v3683_v6, %v2906_v5  ;;  %v2762_v24 = vld [vmem:[#allocation6 + $0x248] sm:$0xf] }
  0x76   :  { %1498 = vmatpush.bf16.msrb.mxu2 %v3143_v48  ;;  %v3659_v48 = vld [vmem:[#allocation6 + $0x2b4] sm:$0xf0]  ;;  %v2874_v29 = vld [vmem:[#allocation6 + $0x328] sm:$0xf] }
  0x77   :  { %1458 = vmatpush.bf16.msra.mxu0 %v2727_v7  ;;  %v2811_v59 = vor.u32 %v3659_v48, %v2810_v47  ;;  %v2506_v7 = vld [vmem:[#allocation6 + $0x48] sm:$0xf]  ;;  %v3615_v15 = vld [vmem:[#allocation6 + $0x154] sm:$0xf0] }
  0x78   :  { %1472 = vmatpush.bf16.msra.mxu1 %v2855_v9  ;;  %v2795_v9 = vor.u32 %v3655_v0, %v2794_v63  ;;  %v3579_v23 = vld [vmem:[#allocation6 + $0x34] sm:$0xf0]  ;;  %v2474_v32 = vld [vmem:[#allocation6 + $0x8] sm:$0xf] }
  0x79   :  { %1486 = vmatpush.bf16.msra.mxu3 %v2983_v12  ;;  %v2778_v12 = vld [vmem:[#allocation6 + $0x268] sm:$0xf]  ;;  %v3611_v27 = vld [vmem:[#allocation6 + $0x134] sm:$0xf0] }
  0x7a   :  { %1499 = vmatpush.bf16.msrb.mxu2 %v3127_v3  ;;  %1459 = vmatmul.bf16.vlgmr.msra.gmra.mxu0 %v4055_v54  ;;  %v2923_v3 = vor.u32 %v3687_v56, %v2922_v55  ;;  %v3575_v33 = vld [vmem:[#allocation6 + $0x14] sm:$0xf0]  ;;  %v2602_v36 = vld [vmem:[#allocation6 + $0x108] sm:$0xf]  ;;  %v2588_v56 = vld [vmem:[#allocation6 + $0xf8] sm:$0xf0] }
  0x7b   :  { %1514 = vmatpush.bf16.msrb.mxu0 %v3239_v19  ;;  %1473 = vmatmul.bf16.vlgmr.msra.gmra.mxu1 %v4059_v60  ;;  %v3679_v19 = vld [vmem:[#allocation6 + $0x354] sm:$0xf0]  ;;  %v3098_v41 = vld [vmem:[#allocation6 + $0x4e8] sm:$0xf]  ;;  %v2475_v47 = vor.u32 %v3575_v33, %v2474_v32  ;;  %v3589_v33 = vld [vmem:[#allocation6 + $0x8c] sm:$0xf] }
  0x7c   :  { %1521 = vmatpush.bf16.msrb.mxu1 %v2587_v13  ;;  %1487 = vmatmul.bf16.vlgmr.msra.gmra.mxu3 %v4071_v37  ;;  %v3651_v13 = vld [vmem:[#allocation6 + $0x274] sm:$0xf0]  ;;  %v2891_v28 = vor.u32 %v3679_v19, %v2890_v18  ;;  %v2858_v48 = vld [vmem:[#allocation6 + $0x308] sm:$0xf] }
  0x7d   :  { %1535 = vmatpush.bf16.msrb.mxu3 %v2715_v17  ;;  %v2507_v17 = vor.u32 %v3583_v11, %v2506_v7  ;;  %v2779_v21 = vor.u32 %v3651_v13, %v2778_v12  ;;  %v3607_v40 = vld [vmem:[#allocation6 + $0x114] sm:$0xf0]  ;;  %v3082_v57 = vld [vmem:[#allocation6 + $0x4c8] sm:$0xf] }
  0x7e   :  { %1500 = vmatpush.bf16.msrb.mxu2 %v3111_v22  ;;  %v2635_v22 = vor.u32 %v3615_v15, %v2634_v14  ;;  %v3731_v43 = vld [vmem:[#allocation6 + $0x4f4] sm:$0xf0]  ;;  %v3210_v62 = vld [vmem:[#allocation6 + $0x5c8] sm:$0xf]  ;;  %v3633_v15 = vld [vmem:[#allocation6 + $0x1ec] sm:$0xf] }
  0x7f   :  { %1549 = vmatpush.bf16.msra.mxu0 %v2843_v30  ;;  %v2491_v30 = vor.u32 %v3579_v23, %v2490_v20  ;;  %v3763_v46 = vld [vmem:[#allocation6 + $0x5f4] sm:$0xf0]  ;;  %v3099_v55 = vor.u32 %v3731_v43, %v3098_v41  ;;  %v2730_v63 = vld [vmem:[#allocation6 + $0x208] sm:$0xf]  ;;  %v2684_v41 = vld [vmem:[#allocation6 + $0x1b8] sm:$0xf0] }
  0x80   :  { %1522 = vmatpush.bf16.msrb.mxu1 %v2571_v26  ;;  %v2618_v26 = vld [vmem:[#allocation6 + $0x128] sm:$0xf]  ;;  %v3671_v49 = vld [vmem:[#allocation6 + $0x314] sm:$0xf0] }
  0x81   :  { %1536 = vmatpush.bf16.msrb.mxu3 %v2699_v31  ;;  %1501 = vmatmul.bf16.vlgmr.msrb.gmra.mxu2 %v4073_v42  ;;  %v3675_v31 = vld [vmem:[#allocation6 + $0x334] sm:$0xf0]  ;;  %v2619_v35 = vor.u32 %v3611_v27, %v2618_v26  ;;  %v2859_v1 = vor.u32 %v3671_v49, %v2858_v48  ;;  %v3066_v11 = vld [vmem:[#allocation6 + $0x4a8] sm:$0xf]  ;;  %v3629_v27 = vld [vmem:[#allocation6 + $0x1cc] sm:$0xf] }
  0x82   :  { %1563 = vmatpush.bf16.msra.mxu2 %v2971_v25  ;;  %v3647_v25 = vld [vmem:[#allocation6 + $0x254] sm:$0xf0]  ;;  %v3162_v43 = vld [vmem:[#allocation6 + $0x568] sm:$0xf]  ;;  %v2524_v48 = vld [vmem:[#allocation6 + $0x78] sm:$0xf0] }
  0x83   :  { %1550 = vmatpush.bf16.msra.mxu0 %v2827_v44  ;;  %v2763_v34 = vor.u32 %v3647_v25, %v2762_v24  ;;  %v2875_v44 = vor.u32 %v3675_v31, %v2874_v29  ;;  %v3639_v0 = vld [vmem:[#allocation6 + $0x214] sm:$0xf0]  ;;  %v3050_v24 = vld [vmem:[#allocation6 + $0x488] sm:$0xf] }
  0x84   :  { %1523 = vmatpush.bf16.msrb.mxu1 %v2555_v39  ;;  %v3643_v39 = vld [vmem:[#allocation6 + $0x234] sm:$0xf0]  ;;  %v2731_v7 = vor.u32 %v3639_v0, %v2730_v63  ;;  %v3178_v29 = vld [vmem:[#allocation6 + $0x588] sm:$0xf]  ;;  %v3581_v63 = vld [vmem:[#allocation6 + $0x4c] sm:$0xf] }
  0x85   :  { %1537 = vmatpush.bf16.msrb.mxu3 %v2683_v45  ;;  %v3226_v45 = vld [vmem:[#allocation6 + $0x5e8] sm:$0xf]  ;;  %v3759_v2 = vld [vmem:[#allocation6 + $0x5d4] sm:$0xf0]  ;;  %v2508_v0 = vld [vmem:[#allocation6 + $0x58] sm:$0xf0] }
  0x86   :  { %1564 = vmatpush.bf16.msra.mxu2 %v2955_v38  ;;  %v2746_v38 = vld [vmem:[#allocation6 + $0x228] sm:$0xf]  ;;  %v3211_v12 = vor.u32 %v3759_v2, %v3210_v62  ;;  %v3723_v13 = vld [vmem:[#allocation6 + $0x4b4] sm:$0xf0] }
  0x87   :  { %1551 = vmatpush.bf16.msra.mxu0 %v2811_v59  ;;  %v2747_v51 = vor.u32 %v3643_v39, %v2746_v38  ;;  %v3727_v59 = vld [vmem:[#allocation6 + $0x4d4] sm:$0xf0]  ;;  %v3067_v20 = vor.u32 %v3723_v13, %v3066_v11  ;;  %v3002_v2 = vld [vmem:[#allocation6 + $0x428] sm:$0xf]  ;;  %v3577_v11 = vld [vmem:[#allocation6 + $0x2c] sm:$0xf] }
  0x88   :  { %1524 = vmatpush.bf16.msrb.mxu1 %v2539_v53  ;;  %v2603_v53 = vor.u32 %v3607_v40, %v2602_v36  ;;  %v3083_v6 = vor.u32 %v3727_v59, %v3082_v57  ;;  %v3755_v18 = vld [vmem:[#allocation6 + $0x5b4] sm:$0xf0]  ;;  %v3034_v36 = vld [vmem:[#allocation6 + $0x468] sm:$0xf]  ;;  %v3625_v40 = vld [vmem:[#allocation6 + $0x1ac] sm:$0xf] }
  0x89   :  { %1538 = vmatpush.bf16.msrb.mxu3 %v2667_v61  ;;  %v3227_v61 = vor.u32 %v3763_v46, %v3226_v45  ;;  %v3719_v26 = vld [vmem:[#allocation6 + $0x494] sm:$0xf0]  ;;  %v2687_v49 = vor.u32 %v3625_v40, %v2684_v41  ;;  %v3146_v57 = vld [vmem:[#allocation6 + $0x548] sm:$0xf]  ;;  %v2492_v13 = vld [vmem:[#allocation6 + $0x38] sm:$0xf0] }
  0x8a   :  { %1565 = vmatpush.bf16.msra.mxu2 %v2939_v52  ;;  %3249 = vmatmul.msk.bf16.vlgmr.msrb.gmra.mxu0 %vm1321_vm0, %v4067_v50  ;;  %v3601_v52 = vld [vmem:[#allocation6 + $0xec] sm:$0xf]  ;;  %v3051_v32 = vor.u32 %v3719_v26, %v3050_v24  ;;  %v3715_v39 = vld [vmem:[#allocation6 + $0x474] sm:$0xf0]  ;;  %v2495_v24 = vor.u32 %v3577_v11, %v2492_v13  ;;  %v2972_v26 = vld [vmem:[#allocation6 + $0x3f8] sm:$0xf0] }
  0x8b   :  { %1552 = vmatpush.bf16.msra.mxu0 %v2795_v9  ;;  %v2591_v5 = vor.u32 %v3601_v52, %v2588_v56  ;;  %v3597_v9 = vld [vmem:[#allocation6 + $0xcc] sm:$0xf]  ;;  %v3035_v46 = vor.u32 %v3715_v39, %v3034_v36  ;;  %v2668_v56 = vld [vmem:[#allocation6 + $0x198] sm:$0xf0]  ;;  %v3743_v59 = vld [vmem:[#allocation6 + $0x554] sm:$0xf0] }
  0x8c   :  { %1525 = vmatpush.bf16.msrb.mxu1 %v2523_v4  ;;  %v3767_v4 = vld [vmem:[#allocation6 + $0x614] sm:$0xf0]  ;;  %v3609_v39 = vld [vmem:[#allocation6 + $0x12c] sm:$0xf]  ;;  %v2620_v40 = vld [vmem:[#allocation6 + $0x138] sm:$0xf0] }
  0x8d   :  { %1539 = vmatpush.bf16.msrb.mxu3 %v2651_v10  ;;  %v2572_v10 = vld [vmem:[#allocation6 + $0xd8] sm:$0xf0]  ;;  %v3757_v11 = vld [vmem:[#allocation6 + $0x5cc] sm:$0xf] }
  0x8e   :  { %1566 = vmatpush.bf16.msra.mxu2 %v2923_v3  ;;  %v3242_v3 = vld [vmem:[#allocation6 + $0x608] sm:$0xf]  ;;  %v2575_v19 = vor.u32 %v3597_v9, %v2572_v10  ;;  %v3739_v9 = vld [vmem:[#allocation6 + $0x534] sm:$0xf0]  ;;  %v2511_v10 = vor.u32 %v3581_v63, %v2508_v0 }
  0x8f   :  { %1553 = vmatpush.bf16.msra.mxu0 %v2779_v21  ;;  %v3243_v14 = vor.u32 %v3767_v4, %v3242_v3  ;;  %v3593_v21 = vld [vmem:[#allocation6 + $0xac] sm:$0xf]  ;;  %v3147_v3 = vor.u32 %v3743_v59, %v3146_v57  ;;  %v3707_v4 = vld [vmem:[#allocation6 + $0x434] sm:$0xf0]  ;;  %v2604_v57 = vld [vmem:[#allocation6 + $0x118] sm:$0xf0] }
  0x90   :  { %1526 = vmatpush.bf16.msrb.mxu1 %v2507_v17  ;;  %v3194_v17 = vld [vmem:[#allocation6 + $0x5a8] sm:$0xf]  ;;  %v2940_v59 = vld [vmem:[#allocation6 + $0x3b8] sm:$0xf0] }
  0x91   :  { %1540 = vmatpush.bf16.msrb.mxu3 %v2635_v22  ;;  %v2556_v22 = vld [vmem:[#allocation6 + $0xb8] sm:$0xf0]  ;;  %v3195_v25 = vor.u32 %v3755_v18, %v3194_v17  ;;  %v3114_v18 = vld [vmem:[#allocation6 + $0x508] sm:$0xf] }
  0x92   :  { %1567 = vmatpush.bf16.msra.mxu2 %v2907_v16  ;;  %v2716_v16 = vld [vmem:[#allocation6 + $0x1f8] sm:$0xf0]  ;;  %v2559_v31 = vor.u32 %v3593_v21, %v2556_v22  ;;  %v3735_v21 = vld [vmem:[#allocation6 + $0x514] sm:$0xf0]  ;;  %v3665_v22 = vld [vmem:[#allocation6 + $0x2ec] sm:$0xf] }
  0x93   :  { %1554 = vmatpush.bf16.msra.mxu0 %v2763_v34  ;;  %v2719_v23 = vor.u32 %v3633_v15, %v2716_v16  ;;  %v2540_v34 = vld [vmem:[#allocation6 + $0x98] sm:$0xf0]  ;;  %v2986_v15 = vld [vmem:[#allocation6 + $0x408] sm:$0xf]  ;;  %v3703_v16 = vld [vmem:[#allocation6 + $0x414] sm:$0xf0] }
  0x94   :  { %1527 = vmatpush.bf16.msrb.mxu1 %v2491_v30  ;;  %v3751_v30 = vld [vmem:[#allocation6 + $0x594] sm:$0xf0]  ;;  %v2543_v45 = vor.u32 %v3589_v33, %v2540_v34  ;;  %v3729_v33 = vld [vmem:[#allocation6 + $0x4ec] sm:$0xf]  ;;  %v3100_v34 = vld [vmem:[#allocation6 + $0x4f8] sm:$0xf0] }
  0x95   :  { %1541 = vmatpush.bf16.msrb.mxu3 %v2619_v35  ;;  %v3179_v38 = vor.u32 %v3751_v30, %v3178_v29  ;;  %v2476_v29 = vld [vmem:[#allocation6 + $0x18] sm:$0xf0] }
  0x96   :  { %1568 = vmatpush.bf16.msra.mxu2 %v2891_v28  ;;  %v2700_v28 = vld [vmem:[#allocation6 + $0x1d8] sm:$0xf0] }
  0x97   :  { %1555 = vmatpush.bf16.msra.mxu0 %v2747_v51  ;;  %v2703_v35 = vor.u32 %v3629_v27, %v2700_v28  ;;  %v3018_v51 = vld [vmem:[#allocation6 + $0x448] sm:$0xf]  ;;  %v2987_v27 = vor.u32 %v3703_v16, %v2986_v15  ;;  %v3573_v28 = vld [vmem:[#allocation6 + $0xc] sm:$0xf]  ;;  %v3052_v16 = vld [vmem:[#allocation6 + $0x498] sm:$0xf0] }
  0x98   :  { %1528 = vmatpush.bf16.msrb.mxu1 %v2475_v47  ;;  %v3585_v47 = vld [vmem:[#allocation6 + $0x6c] sm:$0xf]  ;;  %v2479_v41 = vor.u32 %v3573_v28, %v2476_v29 }
  0x99   :  { %1542 = vmatpush.bf16.msrb.mxu3 %v2603_v53  ;;  %v3711_v53 = vld [vmem:[#allocation6 + $0x454] sm:$0xf0]  ;;  %v3717_v15 = vld [vmem:[#allocation6 + $0x48c] sm:$0xf] }
  0x9a   :  { %1569 = vmatpush.bf16.msra.mxu2 %v2875_v44  ;;  %v3747_v44 = vld [vmem:[#allocation6 + $0x574] sm:$0xf0]  ;;  %v3019_v62 = vor.u32 %v3711_v53, %v3018_v51  ;;  %v3657_v51 = vld [vmem:[#allocation6 + $0x2ac] sm:$0xf] }
  0x9b   :  { %1529 = vmatmul.bf16.vlgmr.msrb.gmra.mxu1 %v4057_v58  ;;  %1556 = vmatpush.bf16.msra.mxu0 %v2731_v7  ;;  %v3163_v52 = vor.u32 %v3747_v44, %v3162_v43  ;;  %v3130_v7 = vld [vmem:[#allocation6 + $0x528] sm:$0xf]  ;;  %v3693_v43 = vld [vmem:[#allocation6 + $0x3cc] sm:$0xf]  ;;  %v2956_v44 = vld [vmem:[#allocation6 + $0x3d8] sm:$0xf0] }
  0x9c   :  { %1577 = vmatpush.bf16.msra.mxu1 %v3099_v55  ;;  %1543 = vmatmul.bf16.vlgmr.msrb.gmra.mxu3 %v4063_v8  ;;  %v3621_v55 = vld [vmem:[#allocation6 + $0x18c] sm:$0xf]  ;;  %v3131_v17 = vor.u32 %v3739_v9, %v3130_v7  ;;  %v2959_v53 = vor.u32 %v3693_v43, %v2956_v44  ;;  %v2796_v7 = vld [vmem:[#allocation6 + $0x298] sm:$0xf0] }
  0x9d   :  { %1591 = vmatpush.bf16.msra.mxu3 %v3227_v61  ;;  %v2527_v61 = vor.u32 %v3585_v47, %v2524_v48  ;;  %v2623_v48 = vor.u32 %v3609_v39, %v2620_v40  ;;  %v3685_v9 = vld [vmem:[#allocation6 + $0x38c] sm:$0xf]  ;;  %v2748_v44 = vld [vmem:[#allocation6 + $0x238] sm:$0xf0] }
  0x9e   :  { %1570 = vmatpush.bf16.msra.mxu2 %v2859_v1  ;;  %1557 = vmatmul.bf16.vlgmr.msra.gmra.mxu0 %v4055_v54  ;;  %v2671_v1 = vor.u32 %v3621_v55, %v2668_v56  ;;  %v3689_v55 = vld [vmem:[#allocation6 + $0x3ac] sm:$0xf] }
  0x9f   :  { %1612 = vmatpush.bf16.msrb.mxu0 %v3243_v14  ;;  %v3605_v56 = vld [vmem:[#allocation6 + $0x10c] sm:$0xf] }
  0xa0   :  { %1578 = vmatpush.bf16.msra.mxu1 %v3083_v6  ;;  %v2652_v6 = vld [vmem:[#allocation6 + $0x178] sm:$0xf0]  ;;  %v3709_v39 = vld [vmem:[#allocation6 + $0x44c] sm:$0xf] }
  0xa1   :  { %1592 = vmatpush.bf16.msra.mxu3 %v3211_v12  ;;  %1571 = vmatmul.bf16.vlgmr.msra.gmra.mxu2 %v4059_v60  ;;  %v3003_v12 = vor.u32 %v3707_v4, %v3002_v2  ;;  %v3721_v2 = vld [vmem:[#allocation6 + $0x4ac] sm:$0xf]  ;;  %v2943_v4 = vor.u32 %v3689_v55, %v2940_v59 }
  0xa2   :  { %1619 = vmatpush.bf16.msrb.mxu2 %v2591_v5  ;;  %v3617_v5 = vld [vmem:[#allocation6 + $0x16c] sm:$0xf] }
  0xa3   :  { %1633 = vmatpush.bf16.msra.mxu0 %v2719_v23  ;;  %v2655_v14 = vor.u32 %v3617_v5, %v2652_v6  ;;  %v2844_v23 = vld [vmem:[#allocation6 + $0x2f8] sm:$0xf0]  ;;  %v3653_v6 = vld [vmem:[#allocation6 + $0x28c] sm:$0xf] }
  0xa4   :  { %1579 = vmatpush.bf16.msra.mxu1 %v3067_v20  ;;  %v2636_v20 = vld [vmem:[#allocation6 + $0x158] sm:$0xf0]  ;;  %v3641_v43 = vld [vmem:[#allocation6 + $0x22c] sm:$0xf] }
  0xa5   :  { %1593 = vmatpush.bf16.msra.mxu3 %v3195_v25  ;;  %v3697_v25 = vld [vmem:[#allocation6 + $0x3ec] sm:$0xf] }
  0xa6   :  { %1620 = vmatpush.bf16.msrb.mxu2 %v2575_v19  ;;  %v3613_v19 = vld [vmem:[#allocation6 + $0x14c] sm:$0xf]  ;;  %v2975_v36 = vor.u32 %v3697_v25, %v2972_v26 }
  0xa7   :  { %1634 = vmatpush.bf16.msra.mxu0 %v2703_v35  ;;  %v2639_v30 = vor.u32 %v3613_v19, %v2636_v20  ;;  %v3661_v35 = vld [vmem:[#allocation6 + $0x2cc] sm:$0xf] }
  0xa8   :  { %1580 = vmatpush.bf16.msra.mxu1 %v3051_v32  ;;  %v2847_v32 = vor.u32 %v3665_v22, %v2844_v23  ;;  %v3649_v19 = vld [vmem:[#allocation6 + $0x26c] sm:$0xf]  ;;  %v3196_v23 = vld [vmem:[#allocation6 + $0x5b8] sm:$0xf0] }
  0xa9   :  { %1594 = vmatpush.bf16.msra.mxu3 %v3179_v38  ;;  %v2828_v38 = vld [vmem:[#allocation6 + $0x2d8] sm:$0xf0]  ;;  %v3681_v20 = vld [vmem:[#allocation6 + $0x36c] sm:$0xf] }
  0xaa   :  { %1621 = vmatpush.bf16.msrb.mxu2 %v2559_v31  ;;  %v3115_v31 = vor.u32 %v3735_v21, %v3114_v18  ;;  %v2831_v47 = vor.u32 %v3661_v35, %v2828_v38  ;;  %v2908_v21 = vld [vmem:[#allocation6 + $0x378] sm:$0xf0]  ;;  %v3753_v22 = vld [vmem:[#allocation6 + $0x5ac] sm:$0xf] }
  0xab   :  { %1635 = vmatpush.bf16.msra.mxu0 %v2687_v49  ;;  %v3084_v49 = vld [vmem:[#allocation6 + $0x4d8] sm:$0xf0]  ;;  %v3713_v26 = vld [vmem:[#allocation6 + $0x46c] sm:$0xf]  ;;  %v2911_v28 = vor.u32 %v3681_v20, %v2908_v21  ;;  %v3199_v29 = vor.u32 %v3753_v22, %v3196_v23  ;;  %v3302_v20 = vld [vmem:[#allocation9 + $0x60] sm:$0xf] }
  0xac   :  { %1581 = vmatpush.bf16.msra.mxu1 %v3035_v46  ;;  %v3725_v46 = vld [vmem:[#allocation6 + $0x4cc] sm:$0xf]  ;;  %v3180_v35 = vld [vmem:[#allocation6 + $0x598] sm:$0xf0] }
  0xad   :  { %1595 = vmatpush.bf16.msra.mxu3 %v3163_v52  ;;  %v2812_v52 = vld [vmem:[#allocation6 + $0x2b8] sm:$0xf0]  ;;  %v3087_v63 = vor.u32 %v3725_v46, %v3084_v49  ;;  %v3637_v59 = vld [vmem:[#allocation6 + $0x20c] sm:$0xf] }
  0xae   :  { %1622 = vmatpush.bf16.msrb.mxu2 %v2543_v45  ;;  %3250 = vmatmul.msk.bf16.vlgmr.msrb.gmra.mxu0 %vm1321_vm0, %v4067_v50  ;;  %v3103_v45 = vor.u32 %v3729_v33, %v3100_v34  ;;  %v2815_v0 = vor.u32 %v3657_v51, %v2812_v52  ;;  %v2892_v33 = vld [vmem:[#allocation6 + $0x358] sm:$0xf0]  ;;  %v3749_v34 = vld [vmem:[#allocation6 + $0x58c] sm:$0xf]  ;;  %v2751_v51 = vor.u32 %v3641_v43, %v2748_v44 }
  0xaf   :  { %1636 = vmatpush.bf16.msra.mxu0 %v2671_v1  ;;  %v2607_v1 = vor.u32 %v3605_v56, %v2604_v57  ;;  %v2876_v46 = vld [vmem:[#allocation6 + $0x338] sm:$0xf0]  ;;  %v3705_v52 = vld [vmem:[#allocation6 + $0x42c] sm:$0xf] }
  0xb0   :  { %1582 = vmatpush.bf16.msra.mxu1 %v3019_v62  ;;  %v3228_v62 = vld [vmem:[#allocation6 + $0x5f8] sm:$0xf0]  ;;  %v3781_v21 = vld [vmem:[#allocation9 + $0x64] sm:$0xf0] }
  0xb1   :  { %1596 = vmatpush.bf16.msra.mxu3 %v3147_v3  ;;  %v3068_v3 = vld [vmem:[#allocation6 + $0x4b8] sm:$0xf0]  ;;  %v3777_v44 = vld [vmem:[#allocation9 + $0x44] sm:$0xf0] }
  0xb2   :  { %1623 = vmatpush.bf16.msrb.mxu2 %v2527_v61  ;;  %v3761_v61 = vld [vmem:[#allocation6 + $0x5ec] sm:$0xf]  ;;  %v3071_v13 = vor.u32 %v3721_v2, %v3068_v3  ;;  %v3148_v2 = vld [vmem:[#allocation6 + $0x558] sm:$0xf0] }
  0xb3   :  { %1637 = vmatpush.bf16.msra.mxu0 %v2655_v14  ;;  %v3231_v5 = vor.u32 %v3761_v61, %v3228_v62  ;;  %v2799_v14 = vor.u32 %v3653_v6, %v2796_v7  ;;  %v2732_v61 = vld [vmem:[#allocation6 + $0x218] sm:$0xf0]  ;;  %v3669_v62 = vld [vmem:[#allocation6 + $0x30c] sm:$0xf] }
  0xb4   :  { %1583 = vmatpush.bf16.msra.mxu1 %v3003_v12  ;;  %v3212_v12 = vld [vmem:[#allocation6 + $0x5d8] sm:$0xf0]  ;;  %v2735_v7 = vor.u32 %v3637_v59, %v2732_v61 }
  0xb5   :  { %1597 = vmatpush.bf16.msra.mxu3 %v3131_v17  ;;  %v3215_v18 = vor.u32 %v3757_v11, %v3212_v12  ;;  %v3783_v6 = vld [vmem:[#allocation9 + $0x74] sm:$0xf0] }
  0xb6   :  { %1624 = vmatpush.bf16.msrb.mxu2 %v2511_v10  ;;  %v2924_v10 = vld [vmem:[#allocation6 + $0x398] sm:$0xf0] }
  0xb7   :  { %1638 = vmatpush.bf16.msra.mxu0 %v2639_v30  ;;  %v2927_v17 = vor.u32 %v3685_v9, %v2924_v10  ;;  %v3645_v30 = vld [vmem:[#allocation6 + $0x24c] sm:$0xf]  ;;  %v2988_v10 = vld [vmem:[#allocation6 + $0x418] sm:$0xf0] }
  0xb8   :  { %1584 = vmatpush.bf16.msra.mxu1 %v2987_v27  ;;  %v3036_v27 = vld [vmem:[#allocation6 + $0x478] sm:$0xf0]  ;;  %v3701_v9 = vld [vmem:[#allocation6 + $0x40c] sm:$0xf] }
  0xb9   :  { %1598 = vmatpush.bf16.msra.mxu3 %v3115_v31  ;;  %v2764_v31 = vld [vmem:[#allocation6 + $0x258] sm:$0xf0] }
  0xba   :  { %1625 = vmatpush.bf16.msrb.mxu2 %v2495_v24  ;;  %v3055_v24 = vor.u32 %v3717_v15, %v3052_v16  ;;  %v2767_v38 = vor.u32 %v3645_v30, %v2764_v31  ;;  %v1334_v55 = vpop.f32.mrf.mxu0  ;;  %v3737_v15 = vld [vmem:[#allocation6 + $0x52c] sm:$0xf]  ;;  %v3795_v43 = vld [vmem:[#allocation9 + $0xd4] sm:$0xf0] }
  0xbb   :  { %1585 = vmatmul.bf16.vlgmr.msra.gmra.mxu1 %v4071_v37  ;;  %1639 = vmatpush.bf16.msra.mxu0 %v2623_v48  ;;  %v3164_v48 = vld [vmem:[#allocation6 + $0x578] sm:$0xf0]  ;;  %v3797_v30 = vld [vmem:[#allocation9 + $0xe4] sm:$0xf0] }
  0xbc   :  { %1647 = vmatpush.bf16.msrb.mxu1 %v2847_v32  ;;  %1599 = vmatmul.bf16.vlgmr.msra.gmra.mxu3 %v4073_v42  ;;  %v3677_v32 = vld [vmem:[#allocation6 + $0x34c] sm:$0xf] }
  0xbd   :  { %1661 = vmatpush.bf16.msrb.mxu3 %v2975_v36  ;;  %v3039_v36 = vor.u32 %v3713_v26, %v3036_v27  ;;  %v2895_v40 = vor.u32 %v3677_v32, %v2892_v33  ;;  %v3303_v27 = vor.u32 %v3781_v21, %v3302_v20  ;;  %v3294_v32 = vld [vmem:[#allocation9 + $0x50] sm:$0xf]  ;;  %v3779_v33 = vld [vmem:[#allocation9 + $0x54] sm:$0xf0] }
  0xbe   :  { %1626 = vmatpush.bf16.msrb.mxu2 %v2479_v41  ;;  %v3183_v41 = vor.u32 %v3749_v34, %v3180_v35  ;;  %v3326_v20 = vld [vmem:[#allocation9 + $0x90] sm:$0xf]  ;;  %v3787_v21 = vld [vmem:[#allocation9 + $0x94] sm:$0xf0] }
  0xbf   :  { %1640 = vmatpush.bf16.msra.mxu0 %v2607_v1  ;;  %v3741_v1 = vld [vmem:[#allocation6 + $0x54c] sm:$0xf]  ;;  %v1362_v3 = vpop.f32.mrf.mxu2 }
  0xc0   :  { %1648 = vmatpush.bf16.msrb.mxu1 %v2831_v47  ;;  %v3745_v47 = vld [vmem:[#allocation6 + $0x56c] sm:$0xf]  ;;  %v3151_v12 = vor.u32 %v3741_v1, %v3148_v2  ;;  %v4099_v2 = vld [vmem:[#allocation8] sm:$0xf] }
  0xc1   :  { %1662 = vmatpush.bf16.msrb.mxu3 %v2959_v53  ;;  %1627 = vmatmul.bf16.vlgmr.msrb.gmra.mxu2 %v4057_v58  ;;  %v2780_v58 = vld [vmem:[#allocation6 + $0x278] sm:$0xf0]  ;;  %v3167_v57 = vor.u32 %v3745_v47, %v3164_v48  ;;  %v3350_v48 = vld [vmem:[#allocation9 + $0xc0] sm:$0xf] }
  0xc2   :  { %1675 = vmatpush.bf16.msra.mxu2 %v3103_v45  ;;  %1641 = vmatmul.bf16.vlgmr.msra.gmra.mxu0 %v4063_v8  ;;  %v2783_v25 = vor.u32 %v3649_v19, %v2780_v58  ;;  %v3020_v8 = vld [vmem:[#allocation6 + $0x458] sm:$0xf0]  ;;  %v3673_v45 = vld [vmem:[#allocation6 + $0x32c] sm:$0xf]  ;;  %v2991_v58 = vor.u32 %v3701_v9, %v2988_v10  ;;  %v1336_v31 = vpop.f32.mrf.mxu0  ;;  %v1746_v9 = vperm.slane %v4099_v2, 0 }
  0xc3   :  { %1689 = vmatpush.bf16.msrb.mxu0 %v3231_v5  ;;  %v3023_v49 = vor.u32 %v3709_v39, %v3020_v8  ;;  %v3004_v53 = vld [vmem:[#allocation6 + $0x438] sm:$0xf0]  ;;  %v2879_v56 = vor.u32 %v3673_v45, %v2876_v46  ;;  %v3310_v5 = vld [vmem:[#allocation9 + $0x70] sm:$0xf]  ;;  %v3334_v10 = vld [vmem:[#allocation9 + $0xa0] sm:$0xf] }
  0xc4   :  { %1649 = vmatpush.bf16.msrb.mxu1 %v2815_v0  ;;  %v2860_v0 = vld [vmem:[#allocation6 + $0x318] sm:$0xf0]  ;;  %v3311_v16 = vor.u32 %v3783_v6, %v3310_v5 }
  0xc5   :  { %1663 = vmatpush.bf16.msrb.mxu3 %v2943_v4  ;;  %v3007_v4 = vor.u32 %v3705_v52, %v3004_v53  ;;  %v2863_v11 = vor.u32 %v3669_v62, %v2860_v0  ;;  %v3799_v19 = vld [vmem:[#allocation9 + $0xf4] sm:$0xf0]  ;;  %v3278_v52 = vld [vmem:[#allocation9 + $0x30] sm:$0xf] }
  0xc6   :  { %1676 = vmatpush.bf16.msra.mxu2 %v3087_v63  ;;  %v1348_v63 = vpop.f32.mrf.mxu1  ;;  %v3775_v53 = vld [vmem:[#allocation9 + $0x34] sm:$0xf0] }
  0xc7   :  { %1690 = vmatpush.bf16.msrb.mxu0 %v3215_v18  ;;  %v3374_v18 = vld [vmem:[#allocation9 + $0xf0] sm:$0xf]  ;;  %v1349_v26 = vadd.f32 %v1348_v63, %v1334_v55  ;;  %v3279_v62 = vor.u32 %v3775_v53, %v3278_v52  ;;  %v3791_v0 = vld [vmem:[#allocation9 + $0xb4] sm:$0xf0]  ;;  %v3794_v53 = vld [vmem:[#allocation9 + $0xd4] sm:$0xf] }
  0xc8   :  { %1650 = vmatpush.bf16.msrb.mxu1 %v2799_v14  ;;  %v3244_v14 = vld [vmem:[#allocation6 + $0x618] sm:$0xf0]  ;;  %v3375_v22 = vor.u32 %v3799_v19, %v3374_v18  ;;  %v3342_v63 = vld [vmem:[#allocation9 + $0xb0] sm:$0xf] }
  0xc9   :  { %1664 = vmatpush.bf16.msrb.mxu3 %v2927_v17  ;;  %v3132_v17 = vld [vmem:[#allocation6 + $0x538] sm:$0xf0]  ;;  %v1363_v8 = vadd.f32 %v1362_v3, %v1349_v26  ;;  %v3270_v3 = vld [vmem:[#allocation9 + $0x20] sm:$0xf]  ;;  %v3343_v5 = vor.u32 %v3791_v0, %v3342_v63  ;;  %v3352_v63 = vld [vmem:[#allocation9 + $0xc8] sm:$0xf0] }
  0xca   :  { %1677 = vmatpush.bf16.msra.mxu2 %v3071_v13  ;;  %v3765_v13 = vld [vmem:[#allocation6 + $0x60c] sm:$0xf] }
  0xcb   :  { %1691 = vmatpush.bf16.msrb.mxu0 %v3199_v29  ;;  %v3247_v23 = vor.u32 %v3765_v13, %v3244_v14  ;;  %v3366_v29 = vld [vmem:[#allocation9 + $0xe0] sm:$0xf]  ;;  %v3262_v13 = vld [vmem:[#allocation9 + $0x10] sm:$0xf]  ;;  %v3771_v14 = vld [vmem:[#allocation9 + $0x14] sm:$0xf0] }
  0xcc   :  { %1651 = vmatpush.bf16.msrb.mxu1 %v2783_v25  ;;  %v3733_v25 = vld [vmem:[#allocation6 + $0x50c] sm:$0xf]  ;;  %v3367_v34 = vor.u32 %v3797_v30, %v3366_v29 }
  0xcd   :  { %1665 = vmatpush.bf16.msrb.mxu3 %v2911_v28  ;;  %v3116_v28 = vld [vmem:[#allocation6 + $0x518] sm:$0xf0] }
  0xce   :  { %1678 = vmatpush.bf16.msra.mxu2 %v3055_v24  ;;  %v3135_v24 = vor.u32 %v3737_v15, %v3132_v17  ;;  %v1350_v35 = vpop.f32.mrf.mxu1  ;;  %v3119_v39 = vor.u32 %v3733_v25, %v3116_v28  ;;  %v3327_v25 = vor.u32 %v3787_v21, %v3326_v20  ;;  %v3312_v28 = vld [vmem:[#allocation9 + $0x78] sm:$0xf0] }
  0xcf   :  { %1692 = vmatpush.bf16.msrb.mxu0 %v3183_v41  ;;  %v3358_v41 = vld [vmem:[#allocation9 + $0xd0] sm:$0xf]  ;;  %v1351_v47 = vadd.f32 %v1350_v35, %v1336_v31  ;;  %v3798_v35 = vld [vmem:[#allocation9 + $0xf4] sm:$0xf]  ;;  %v3264_v21 = vld [vmem:[#allocation9 + $0x18] sm:$0xf0] }
  0xd0   :  { %1652 = vmatpush.bf16.msrb.mxu1 %v2767_v38  ;;  %v1364_v38 = vpop.f32.mrf.mxu2  ;;  %v3359_v45 = vor.u32 %v3795_v43, %v3358_v41 }
  0xd1   :  { %1666 = vmatpush.bf16.msrb.mxu3 %v2895_v40  ;;  %v3295_v40 = vor.u32 %v3779_v33, %v3294_v32  ;;  %v1365_v59 = vadd.f32 %v1364_v38, %v1351_v47  ;;  %v3318_v32 = vld [vmem:[#allocation9 + $0x80] sm:$0xf]  ;;  %v3785_v33 = vld [vmem:[#allocation9 + $0x84] sm:$0xf0]  ;;  %v3368_v47 = vld [vmem:[#allocation9 + $0xe8] sm:$0xf0] }
  0xd2   :  { %1679 = vmatpush.bf16.msra.mxu2 %v3039_v36  ;;  %v1376_v36 = vpop.f32.mrf.mxu3 }
  0xd3   :  { %1693 = vmatpush.bf16.msrb.mxu0 %v3167_v57  ;;  %v1377_v46 = vadd.f32 %v1376_v36, %v1363_v8  ;;  %v3376_v36 = vld [vmem:[#allocation9 + $0xf8] sm:$0xf0]  ;;  %v3780_v8 = vld [vmem:[#allocation9 + $0x64] sm:$0xf] }
  0xd4   :  { %1653 = vmatpush.bf16.msrb.mxu1 %v2751_v51  ;;  %v3379_v41 = vor.u32 %v3798_v35, %v3376_v36  ;;  %v3256_v35 = vld [vmem:[#allocation9 + $0x8] sm:$0xf0] }
  0xd5   :  { %1667 = vmatpush.bf16.msrb.mxu3 %v2879_v56 }
  0xd6   :  { %1680 = vmatpush.bf16.msra.mxu2 %v3023_v49  ;;  %v3793_v49 = vld [vmem:[#allocation9 + $0xc4] sm:$0xf0] }
  0xd7   :  { %1694 = vmatpush.bf16.msrb.mxu0 %v3151_v12  ;;  %v1390_v51 = vpop.f32.mrf.mxu0  ;;  %v3351_v55 = vor.u32 %v3793_v49, %v3350_v48  ;;  %v3778_v48 = vld [vmem:[#allocation9 + $0x54] sm:$0xf]  ;;  %v3296_v49 = vld [vmem:[#allocation9 + $0x58] sm:$0xf0] }
  0xd8   :  { %1654 = vmatpush.bf16.msrb.mxu1 %v2735_v7  ;;  %v1404_v56 = vpop.f32.mrf.mxu1  ;;  %v1418_v57 = vpop.f32.mrf.mxu2  ;;  %v3299_v52 = vor.u32 %v3778_v48, %v3296_v49 }
  0xd9   :  { %1668 = vmatpush.bf16.msrb.mxu3 %v2863_v11  ;;  %v3789_v11 = vld [vmem:[#allocation9 + $0xa4] sm:$0xf0] }
  0xda   :  { %1681 = vmatpush.bf16.msra.mxu2 %v3007_v4  ;;  %v1378_v1 = vpop.f32.mrf.mxu3  ;;  %v3773_v4 = vld [vmem:[#allocation9 + $0x24] sm:$0xf0]  ;;  %v3335_v15 = vor.u32 %v3789_v11, %v3334_v10 }
  0xdb   :  { %1655 = vmatmul.bf16.vlgmr.msrb.gmra.mxu1 %v4055_v54  ;;  %1695 = vmatpush.bf16.msrb.mxu0 %v3135_v24  ;;  %v3286_v54 = vld [vmem:[#allocation9 + $0x40] sm:$0xf]  ;;  %v1379_v6 = vadd.f32 %v1378_v1, %v1365_v59  ;;  %v3769_v24 = vld [vmem:[#allocation9 + $0x4] sm:$0xf0]  ;;  %v3774_v1 = vld [vmem:[#allocation9 + $0x34] sm:$0xf] }
  0xdc   :  { %2186 = vmatpush.bf16.msra.mxu1 %v3375_v22  ;;  %1669 = vmatmul.bf16.vlgmr.msrb.gmra.mxu3 %v4059_v60  ;;  %v3287_v60 = vor.u32 %v3777_v44, %v3286_v54 }
  0xdd   :  { %2172 = vmatpush.bf16.msra.mxu3 %v3311_v16 }
  0xde   :  { %1682 = vmatpush.bf16.msra.mxu2 %v2991_v58  ;;  %v3263_v58 = vor.u32 %v3771_v14, %v3262_v13  ;;  %v3272_v13 = vld [vmem:[#allocation9 + $0x28] sm:$0xf0] }
  0xdf   :  { %1696 = vmatpush.bf16.msrb.mxu0 %v3119_v39  ;;  %v1392_v12 = vpop.f32.mrf.mxu0 }
  0xe0   :  { %2187 = vmatpush.bf16.msra.mxu1 %v3367_v34  ;;  %v1393_v16 = vadd.f32 %v1392_v12, %v1379_v6  ;;  %v1406_v17 = vpop.f32.mrf.mxu1  ;;  %v1420_v22 = vpop.f32.mrf.mxu2  ;;  %v3772_v12 = vld [vmem:[#allocation9 + $0x24] sm:$0xf] }
  0xe1   :  { %2173 = vmatpush.bf16.msra.mxu3 %v3303_v27  ;;  %1683 = vmatmul.bf16.vlgmr.msra.gmra.mxu2 %v4071_v37  ;;  %v1391_v37 = vadd.f32 %v1390_v51, %v1377_v46  ;;  %v3782_v27 = vld [vmem:[#allocation9 + $0x74] sm:$0xf]  ;;  %v3796_v46 = vld [vmem:[#allocation9 + $0xe4] sm:$0xf] }
  0xe2   :  { %1710 = vmatpush.bf16.msrb.mxu2 %v3247_v23  ;;  %1697 = vmatmul.bf16.vlgmr.msrb.gmra.mxu0 %v4073_v42  ;;  %v3271_v42 = vor.u32 %v3773_v4, %v3270_v3  ;;  %v1407_v19 = vadd.f32 %v1406_v17, %v1393_v16  ;;  %v3254_v23 = vld [vmem:[#allocation9] sm:$0xf]  ;;  %v3315_v34 = vor.u32 %v3782_v27, %v3312_v28  ;;  %v1432_v39 = vpop.f32.mrf.mxu3  ;;  %v3280_v3 = vld [vmem:[#allocation9 + $0x38] sm:$0xf0]  ;;  %v3770_v16 = vld [vmem:[#allocation9 + $0x14] sm:$0xf] }
  0xe3   :  { %v1405_v61 = vadd.f32 %v1404_v56, %v1391_v37  ;;  %v3255_v31 = vor.u32 %v3769_v24, %v3254_v23  ;;  %v3371_v51 = vor.u32 %v3796_v46, %v3368_v47  ;;  %v3776_v37 = vld [vmem:[#allocation9 + $0x44] sm:$0xf]  ;;  %v3288_v56 = vld [vmem:[#allocation9 + $0x48] sm:$0xf0]  ;;  %v3438_v23 = vld [vmem:[#allocation9 + $0x170] sm:$0xf] }
  0xe4   :  { %2188 = vmatpush.bf16.msra.mxu1 %v3359_v45  ;;  %v1421_v26 = vadd.f32 %v1420_v22, %v1407_v19  ;;  %v3788_v17 = vld [vmem:[#allocation9 + $0xa4] sm:$0xf]  ;;  %v3815_v24 = vld [vmem:[#allocation9 + $0x174] sm:$0xf0]  ;;  %v3786_v27 = vld [vmem:[#allocation9 + $0x94] sm:$0xf] }
  0xe5   :  { %2174 = vmatpush.bf16.msra.mxu3 %v3295_v40  ;;  %v1419_v7 = vadd.f32 %v1418_v57, %v1405_v61  ;;  %v3304_v40 = vld [vmem:[#allocation9 + $0x68] sm:$0xf0]  ;;  %v3291_v61 = vor.u32 %v3776_v37, %v3288_v56  ;;  %v3328_v28 = vld [vmem:[#allocation9 + $0x98] sm:$0xf0]  ;;  %v3811_v46 = vld [vmem:[#allocation9 + $0x154] sm:$0xf0] }
  0xe6   :  { %v1758_v30 = vadd.f32 %v1746_v9, %v1421_v26  ;;  %v3307_v45 = vor.u32 %v3780_v8, %v3304_v40  ;;  %v3439_v26 = vor.u32 %v3815_v24, %v3438_v23  ;;  %v3331_v36 = vor.u32 %v3786_v27, %v3328_v28  ;;  %v3784_v40 = vld [vmem:[#allocation9 + $0x84] sm:$0xf]  ;;  %v3809_v37 = vld [vmem:[#allocation9 + $0x144] sm:$0xf0]  ;;  %v3406_v56 = vld [vmem:[#allocation9 + $0x130] sm:$0xf] }
  0xe7   :  { %v1754_v18 = vadd.f32 %v1746_v9, %v1419_v7  ;;  %v3283_v7 = vor.u32 %v3774_v1, %v3280_v3  ;;  %v3790_v9 = vld [vmem:[#allocation9 + $0xb4] sm:$0xf] }
  0xe8   :  { %2189 = vmatpush.bf16.msra.mxu1 %v3351_v55  ;;  %v1766_v38 = vmul.f32 0.2, %v1758_v30  ;;  %v1446_v44 = vpop.f32.mrf.mxu2  ;;  %v3360_v55 = vld [vmem:[#allocation9 + $0xd8] sm:$0xf0]  ;;  %2200 = vmatpush.bf16.msra.mxu2 %v3439_v26  ;;  %v3810_v24 = vld [vmem:[#allocation9 + $0x154] sm:$0xf] }
  0xe9   :  { %2175 = vmatpush.bf16.msra.mxu3 %v3287_v60  ;;  %v1762_v29 = vmul.f32 0.2, %v1754_v18  ;;  %v3363_v57 = vor.u32 %v3794_v53, %v3360_v55  ;;  %v1447_v0 = vadd.f32 %v1446_v44, %v1432_v39  ;;  %v3414_v55 = vld [vmem:[#allocation9 + $0x140] sm:$0xf] }
  0xea   :  { %v1774_v54 = vmax.f32 %v1758_v30, %v1766_v38  ;;  %v1434_v59 = vpop.f32.mrf.mxu3 }
  0xeb   :  { %v1770_v43 = vmax.f32 %v1754_v18, %v1762_v29  ;;  %v3336_v18 = vld [vmem:[#allocation9 + $0xa8] sm:$0xf0]  ;;  %v3430_v29 = vld [vmem:[#allocation9 + $0x160] sm:$0xf] }
  0xec   :  { %2190 = vmatpush.bf16.msra.mxu1 %v3343_v5  ;;  %v3339_v22 = vor.u32 %v3788_v17, %v3336_v18  ;;  %v3814_v18 = vld [vmem:[#allocation9 + $0x174] sm:$0xf] }
  0xed   :  { %2176 = vmatpush.bf16.msra.mxu3 %v3279_v62  ;;  %v4104_v60 = vpack.c.bf16 %v1774_v54, %v1770_v43  ;;  %v3792_v62 = vld [vmem:[#allocation9 + $0xc4] sm:$0xf] }
  0xee   :  { %v3355_v4 = vor.u32 %v3792_v62, %v3352_v63 }
  0xf0   :  { %2191 = vmatpush.bf16.msra.mxu1 %v3335_v15  ;;  %v1448_v6 = vpop.f32.mrf.mxu2  ;;  %v3275_v15 = vor.u32 %v3772_v12, %v3272_v13  ;;  %v3390_v12 = vld [vmem:[#allocation9 + $0x110] sm:$0xf]  ;;  %v3803_v13 = vld [vmem:[#allocation9 + $0x114] sm:$0xf0] }
  0xf1   :  { %2177 = vmatpush.bf16.msra.mxu3 %v3271_v42  ;;  %3251 = vmatmul.msk.bf16.vlgmr.msrb.gmra.mxu2 %vm1321_vm0, %v4067_v50  ;;  %v3319_v50 = vor.u32 %v3785_v33, %v3318_v32  ;;  %v3344_v42 = vld [vmem:[#allocation9 + $0xb8] sm:$0xf0]  ;;  %v1449_v19 = vadd.f32 %v1448_v6, %v1434_v59  ;;  %v3813_v32 = vld [vmem:[#allocation9 + $0x164] sm:$0xf0]  ;;  %v3415_v59 = vor.u32 %v3809_v37, %v3414_v55  ;;  %v3398_v6 = vld [vmem:[#allocation9 + $0x120] sm:$0xf] }
  0xf2   :  { %v3347_v14 = vor.u32 %v3790_v9, %v3344_v42  ;;  %v3431_v38 = vor.u32 %v3813_v32, %v3430_v29  ;;  %v3808_v29 = vld [vmem:[#allocation9 + $0x144] sm:$0xf]  ;;  %v3486_v55 = vld [vmem:[#allocation9 + $0x1d0] sm:$0xf]  ;;  %v3827_v37 = vld [vmem:[#allocation9 + $0x1d4] sm:$0xf0] }
  0xf4   :  { %2192 = vmatpush.bf16.msra.mxu1 %v3327_v25  ;;  %2201 = vmatpush.bf16.msra.mxu2 %v3431_v38 }
  0xf5   :  { %2178 = vmatpush.bf16.msra.mxu3 %v3263_v58 }
  0xf7   :  { %v1460_v5 = vpop.f32.mrf.mxu0 }
  0xf8   :  { %2193 = vmatpush.bf16.msra.mxu1 %v3319_v50  ;;  %v1461_v10 = vadd.f32 %v1460_v5, %v1447_v0  ;;  %v1474_v11 = vpop.f32.mrf.mxu1  ;;  %v3768_v50 = vld [vmem:[#allocation9 + $0x4] sm:$0xf] }
  0xf9   :  { %2179 = vmatpush.bf16.msra.mxu3 %v3255_v31  ;;  %v3267_v31 = vor.u32 %v3770_v16, %v3264_v21  ;;  %v3259_v8 = vor.u32 %v3768_v50, %v3256_v35  ;;  %v3801_v16 = vld [vmem:[#allocation9 + $0x104] sm:$0xf0]  ;;  %v3432_v21 = vld [vmem:[#allocation9 + $0x168] sm:$0xf0]  ;;  %v3502_v35 = vld [vmem:[#allocation9 + $0x1f0] sm:$0xf] }
  0xfa   :  { %v1475_v58 = vadd.f32 %v1474_v11, %v1461_v10 }
  0xfc   :  { %2242 = vmatpush.bf16.msrb.mxu1 %v3379_v41  ;;  %2180 = vmatmul.bf16.vlgmr.msra.gmra.mxu3 %v4104_v60  ;;  %v3320_v41 = vld [vmem:[#allocation9 + $0x88] sm:$0xf0] }
  0xfd   :  { %2228 = vmatpush.bf16.msrb.mxu3 %v3315_v34  ;;  %v3323_v44 = vor.u32 %v3784_v40, %v3320_v41  ;;  %v3804_v40 = vld [vmem:[#allocation9 + $0x124] sm:$0xf]  ;;  %v3400_v41 = vld [vmem:[#allocation9 + $0x128] sm:$0xf0] }
  0xff   :  { %v1488_v20 = vpop.f32.mrf.mxu3  ;;  %v1462_v25 = vpop.f32.mrf.mxu0 }
 0x100   :  { %2243 = vmatpush.bf16.msrb.mxu1 %v3371_v51  ;;  %v1489_v33 = vadd.f32 %v1488_v20, %v1475_v58  ;;  %v1463_v34 = vadd.f32 %v1462_v25, %v1449_v19  ;;  %v1476_v39 = vpop.f32.mrf.mxu1  ;;  %v1747_v51 = vperm.slane %v4099_v2, 1  ;;  %v3440_v19 = vld [vmem:[#allocation9 + $0x178] sm:$0xf0]  ;;  %v3812_v20 = vld [vmem:[#allocation9 + $0x164] sm:$0xf] }
 0x101   :  { %2229 = vmatpush.bf16.msrb.mxu3 %v3307_v45  ;;  %v3422_v45 = vld [vmem:[#allocation9 + $0x150] sm:$0xf]  ;;  %v3443_v58 = vor.u32 %v3814_v18, %v3440_v19  ;;  %v3435_v23 = vor.u32 %v3812_v20, %v3432_v21  ;;  %v3424_v25 = vld [vmem:[#allocation9 + $0x158] sm:$0xf0]  ;;  %v3462_v18 = vld [vmem:[#allocation9 + $0x1a0] sm:$0xf] }
 0x102   :  { %v1477_v54 = vadd.f32 %v1476_v39, %v1463_v34  ;;  %v3423_v49 = vor.u32 %v3811_v46, %v3422_v45  ;;  %v3427_v27 = vor.u32 %v3810_v24, %v3424_v25  ;;  %v3408_v34 = vld [vmem:[#allocation9 + $0x138] sm:$0xf0]  ;;  %v3403_v45 = vor.u32 %v3804_v40, %v3400_v41  ;;  %v3829_v46 = vld [vmem:[#allocation9 + $0x1e4] sm:$0xf0]  ;;  %v3819_v24 = vld [vmem:[#allocation9 + $0x194] sm:$0xf0] }
 0x103   :  { %v3821_v19 = vld [vmem:[#allocation9 + $0x1a4] sm:$0xf0]  ;;  %v3496_v40 = vld [vmem:[#allocation9 + $0x1e8] sm:$0xf0] }
 0x104   :  { %2244 = vmatpush.bf16.msrb.mxu1 %v3363_v57  ;;  %v1502_v30 = vpop.f32.mrf.mxu2  ;;  %2202 = vmatpush.bf16.msra.mxu2 %v3423_v49  ;;  %v3463_v21 = vor.u32 %v3821_v19, %v3462_v18 }
 0x105   :  { %2230 = vmatpush.bf16.msrb.mxu3 %v3299_v52  ;;  %v1503_v43 = vadd.f32 %v1502_v30, %v1489_v33  ;;  %v3416_v30 = vld [vmem:[#allocation9 + $0x148] sm:$0xf0]  ;;  %v3806_v33 = vld [vmem:[#allocation9 + $0x134] sm:$0xf] }
 0x106   :  { %v3411_v50 = vor.u32 %v3806_v33, %v3408_v34 }
 0x107   :  { %v1490_v47 = vpop.f32.mrf.mxu3  ;;  %v1516_v48 = vpop.f32.mrf.mxu0 }
 0x108   :  { %2245 = vmatpush.bf16.msrb.mxu1 %v3355_v4  ;;  %v1491_v52 = vadd.f32 %v1490_v47, %v1477_v54  ;;  %v1517_v53 = vadd.f32 %v1516_v48, %v1503_v43  ;;  %2203 = vmatpush.bf16.msra.mxu2 %v3415_v59  ;;  %v3494_v43 = vld [vmem:[#allocation9 + $0x1e0] sm:$0xf]  ;;  %v3487_v59 = vor.u32 %v3827_v37, %v3486_v55  ;;  %v3822_v37 = vld [vmem:[#allocation9 + $0x1b4] sm:$0xf] }
 0x109   :  { %2231 = vmatpush.bf16.msrb.mxu3 %v3291_v61  ;;  %v3807_v61 = vld [vmem:[#allocation9 + $0x134] sm:$0xf0]  ;;  %v3495_v48 = vor.u32 %v3829_v46, %v3494_v43 }
 0x10a   :  { %v3407_v62 = vor.u32 %v3807_v61, %v3406_v56  ;;  %v1755_v63 = vadd.f32 %v1747_v51, %v1517_v53 }
 0x10c   :  { %2246 = vmatpush.bf16.msrb.mxu1 %v3347_v14  ;;  %v1504_v57 = vpop.f32.mrf.mxu2  ;;  %2204 = vmatpush.bf16.msra.mxu2 %v3407_v62  ;;  %v1763_v4 = vmul.f32 0.2, %v1755_v63  ;;  %v3391_v14 = vor.u32 %v3803_v13, %v3390_v12  ;;  %v3800_v62 = vld [vmem:[#allocation9 + $0x104] sm:$0xf]  ;;  %v3823_v12 = vld [vmem:[#allocation9 + $0x1b4] sm:$0xf0] }
 0x10d   :  { %2232 = vmatpush.bf16.msrb.mxu3 %v3283_v7  ;;  %v1505_v0 = vadd.f32 %v1504_v57, %v1491_v52  ;;  %v3805_v7 = vld [vmem:[#allocation9 + $0x124] sm:$0xf0]  ;;  %v3392_v52 = vld [vmem:[#allocation9 + $0x118] sm:$0xf0] }
 0x10e   :  { %v3399_v9 = vor.u32 %v3805_v7, %v3398_v6  ;;  %v1771_v10 = vmax.f32 %v1755_v63, %v1763_v4  ;;  %v3384_v63 = vld [vmem:[#allocation9 + $0x108] sm:$0xf0]  ;;  %v3478_v4 = vld [vmem:[#allocation9 + $0x1c0] sm:$0xf] }
 0x10f   :  { %v1518_v1 = vpop.f32.mrf.mxu0 }
 0x110   :  { %2247 = vmatpush.bf16.msrb.mxu1 %v3339_v22  ;;  %v1519_v3 = vadd.f32 %v1518_v1, %v1505_v0  ;;  %2205 = vmatpush.bf16.msra.mxu2 %v3399_v9 }
 0x111   :  { %2233 = vmatpush.bf16.msrb.mxu3 %v3275_v15  ;;  %v3382_v15 = vld [vmem:[#allocation9 + $0x100] sm:$0xf] }
 0x112   :  { %v1759_v5 = vadd.f32 %v1747_v51, %v1519_v3  ;;  %v3383_v17 = vor.u32 %v3801_v16, %v3382_v15  ;;  %v3802_v51 = vld [vmem:[#allocation9 + $0x114] sm:$0xf]  ;;  %v3387_v3 = vor.u32 %v3800_v62, %v3384_v63  ;;  %v3464_v62 = vld [vmem:[#allocation9 + $0x1a8] sm:$0xf0] }
 0x113   :  { %v3395_v53 = vor.u32 %v3802_v51, %v3392_v52 }
 0x114   :  { %2248 = vmatpush.bf16.msrb.mxu1 %v3331_v36  ;;  %v1767_v42 = vmul.f32 0.2, %v1759_v5  ;;  %2206 = vmatpush.bf16.msra.mxu2 %v3391_v14  ;;  %v3831_v36 = vld [vmem:[#allocation9 + $0x1f4] sm:$0xf0] }
 0x115   :  { %2234 = vmatpush.bf16.msrb.mxu3 %v3267_v31  ;;  %v3419_v31 = vor.u32 %v3808_v29, %v3416_v30  ;;  %v3503_v39 = vor.u32 %v3831_v36, %v3502_v35  ;;  %v3830_v35 = vld [vmem:[#allocation9 + $0x1f4] sm:$0xf]  ;;  %v3504_v36 = vld [vmem:[#allocation9 + $0x1f8] sm:$0xf0] }
 0x116   :  { %v1775_v11 = vmax.f32 %v1759_v5, %v1767_v42  ;;  %v3825_v5 = vld [vmem:[#allocation9 + $0x1c4] sm:$0xf0] }
 0x117   :  { %2214 = vmatpush.bf16.msra.mxu0 %v3503_v39  ;;  %v3479_v9 = vor.u32 %v3825_v5, %v3478_v4 }
 0x118   :  { %2249 = vmatpush.bf16.msrb.mxu1 %v3323_v44  ;;  %2207 = vmatpush.bf16.msra.mxu2 %v3383_v17  ;;  %v1530_v22 = vpop.f32.mrf.mxu1 }
 0x119   :  { %2235 = vmatpush.bf16.msrb.mxu3 %v3259_v8 }
 0x11b   :  { %v1558_v26 = vpop.f32.mrf.mxu0  ;;  %2215 = vmatpush.bf16.msra.mxu0 %v3495_v48  ;;  %v3480_v48 = vld [vmem:[#allocation9 + $0x1c8] sm:$0xf0] }
 0x11c   :  { %2236 = vmatmul.bf16.vlgmr.msrb.gmra.mxu3 %v4104_v60  ;;  %v1779_v60 = vpack.c.bf16 %v1775_v11, %v1771_v10  ;;  %2256 = vmatpush.bf16.msrb.mxu2 %v3443_v58  ;;  %v3470_v11 = vld [vmem:[#allocation9 + $0x1b0] sm:$0xf] }
 0x11d   :  { %v3471_v15 = vor.u32 %v3823_v12, %v3470_v11 }
 0x11e   :  { %2194 = vmatmul.bf16.vlgmr.msra.gmra.mxu1 %v1779_v60 }
 0x11f   :  { %v1544_v28 = vpop.f32.mrf.mxu3  ;;  %2216 = vmatpush.bf16.msra.mxu0 %v3487_v59 }
 0x120   :  { %2257 = vmatpush.bf16.msrb.mxu2 %v3435_v23  ;;  %v1532_v32 = vpop.f32.mrf.mxu1  ;;  %v1545_v38 = vadd.f32 %v1544_v28, %v1530_v22  ;;  %v3454_v23 = vld [vmem:[#allocation9 + $0x190] sm:$0xf] }
 0x122   :  { %v1559_v47 = vadd.f32 %v1558_v26, %v1545_v38  ;;  %v3455_v26 = vor.u32 %v3819_v24, %v3454_v23  ;;  %v3507_v38 = vor.u32 %v3830_v35, %v3504_v36  ;;  %v3834_v35 = vld [vmem:[#allocation11 + $0x10] sm:$0xff] }
 0x123   :  { %v1560_v8 = vpop.f32.mrf.mxu0  ;;  %2217 = vmatpush.bf16.msra.mxu0 %v3479_v9  ;;  %v3846_v36 = vld [vmem:[#allocation11 + $0x70] sm:$0xff] }
 0x124   :  { %2258 = vmatpush.bf16.msrb.mxu2 %v3427_v27  ;;  %v1572_v54 = vpop.f32.mrf.mxu2 }
 0x125   :  { %v1573_v56 = vadd.f32 %v1572_v54, %v1559_v47  ;;  %v3824_v47 = vld [vmem:[#allocation9 + $0x1c4] sm:$0xf] }
 0x127   :  { %v1546_v44 = vpop.f32.mrf.mxu3  ;;  %2218 = vmatpush.bf16.msra.mxu0 %v3471_v15 }
 0x128   :  { %2259 = vmatpush.bf16.msrb.mxu2 %v3419_v31  ;;  %v1547_v57 = vadd.f32 %v1546_v44, %v1532_v32  ;;  %v3446_v31 = vld [vmem:[#allocation9 + $0x180] sm:$0xf]  ;;  %v3817_v32 = vld [vmem:[#allocation9 + $0x184] sm:$0xf0]  ;;  %v3826_v44 = vld [vmem:[#allocation9 + $0x1d4] sm:$0xf] }
 0x12a   :  { %v1561_v6 = vadd.f32 %v1560_v8, %v1547_v57  ;;  %v3828_v8 = vld [vmem:[#allocation9 + $0x1e4] sm:$0xf] }
 0x12b   :  { %v1614_v0 = vpop.f32.mrf.mxu0  ;;  %2219 = vmatpush.bf16.msra.mxu0 %v3463_v21  ;;  %v3499_v41 = vor.u32 %v3828_v8, %v3496_v40  ;;  %v3832_v8 = vld [vmem:[#allocation11] sm:$0xff] }
 0x12c   :  { %2260 = vmatpush.bf16.msrb.mxu2 %v3411_v50  ;;  %v1574_v42 = vpop.f32.mrf.mxu2  ;;  %v3447_v50 = vor.u32 %v3817_v32, %v3446_v31  ;;  %v3839_v31 = vld [vmem:[#allocation11 + $0x38] sm:$0xff]  ;;  %v3838_v32 = vld [vmem:[#allocation11 + $0x30] sm:$0xff]  ;;  %v3844_v40 = vld [vmem:[#allocation11 + $0x60] sm:$0xff] }
 0x12d   :  { %v1575_v13 = vadd.f32 %v1574_v42, %v1561_v6  ;;  %v3816_v42 = vld [vmem:[#allocation9 + $0x184] sm:$0xf]  ;;  %2422 = vmatpush.bf16.msra.mxu3 %v3839_v31 }
 0x12e   :  { %2250 = vmatmul.bf16.vlgmr.msrb.gmra.mxu1 %v1779_v60  ;;  %v1748_v60 = vperm.slane %v4099_v2, 2 }
 0x12f   :  { %2220 = vmatpush.bf16.msra.mxu0 %v3455_v26 }
 0x130   :  { %2261 = vmatpush.bf16.msrb.mxu2 %v3403_v45  ;;  %v3488_v45 = vld [vmem:[#allocation9 + $0x1d8] sm:$0xf0] }
 0x131   :  { %v3491_v46 = vor.u32 %v3826_v44, %v3488_v45  ;;  %2423 = vmatpush.bf16.msra.mxu3 %v3838_v32  ;;  %v3842_v44 = vld [vmem:[#allocation11 + $0x50] sm:$0xff] }
 0x133   :  { %v1616_v22 = vpop.f32.mrf.mxu0  ;;  %2221 = vmatpush.bf16.msra.mxu0 %v3447_v50  ;;  %v3847_v50 = vld [vmem:[#allocation11 + $0x78] sm:$0xff] }
 0x134   :  { %2262 = vmatpush.bf16.msrb.mxu2 %v3395_v53  ;;  %2436 = vmatpush.bf16.msra.mxu1 %v3847_v50 }
 0x137   :  { %2270 = vmatpush.bf16.msrb.mxu0 %v3507_v38  ;;  %v3833_v38 = vld [vmem:[#allocation11 + $0x8] sm:$0xff] }
 0x138   :  { %v1586_v49 = vpop.f32.mrf.mxu1  ;;  %2263 = vmatpush.bf16.msrb.mxu2 %v3387_v3  ;;  %2437 = vmatpush.bf16.msra.mxu1 %v3846_v36 }
 0x139   :  { %v1587_v61 = vadd.f32 %v1586_v49, %v1573_v56  ;;  %v3483_v49 = vor.u32 %v3824_v47, %v3480_v48  ;;  %v3472_v56 = vld [vmem:[#allocation9 + $0x1b8] sm:$0xf0]  ;;  %v3841_v47 = vld [vmem:[#allocation11 + $0x48] sm:$0xff] }
 0x13a   :  { %v3475_v57 = vor.u32 %v3822_v37, %v3472_v56 }
 0x13b   :  { %2271 = vmatpush.bf16.msrb.mxu0 %v3499_v41  ;;  %v3843_v41 = vld [vmem:[#allocation11 + $0x58] sm:$0xff] }
 0x13f   :  { %v1600_v1 = vpop.f32.mrf.mxu3  ;;  %v1642_v43 = vpop.f32.mrf.mxu0  ;;  %2272 = vmatpush.bf16.msrb.mxu0 %v3491_v46  ;;  %v1846_v46 = vld [vmem:[%s4128_s5] sm:$0x3] }
 0x140   :  { %v1601_v7 = vadd.f32 %v1600_v1, %v1587_v61  ;;  %v1588_v10 = vpop.f32.mrf.mxu1  ;;  %v3820_v61 = vld [vmem:[#allocation9 + $0x1a4] sm:$0xf]  ;;  %v3456_v1 = vld [vmem:[#allocation9 + $0x198] sm:$0xf0]  ;;  %v1848_v48 = vperm.slane %v1846_v46, 0 }
 0x141   :  { %v1589_v16 = vadd.f32 %v1588_v10, %v1575_v13  ;;  %v3467_v63 = vor.u32 %v3820_v61, %v3464_v62  ;;  %v3448_v10 = vld [vmem:[#allocation9 + $0x188] sm:$0xf0] }
 0x142   :  { %v1615_v14 = vadd.f32 %v1614_v0, %v1601_v7  ;;  %v3818_v0 = vld [vmem:[#allocation9 + $0x194] sm:$0xf] }
 0x143   :  { %2273 = vmatpush.bf16.msrb.mxu0 %v3483_v49  ;;  %v3459_v6 = vor.u32 %v3818_v0, %v3456_v1  ;;  %v3840_v49 = vld [vmem:[#allocation11 + $0x40] sm:$0xff] }
 0x144   :  { %v1756_v58 = vadd.f32 %v1748_v60, %v1615_v14  ;;  %v1628_v29 = vpop.f32.mrf.mxu2 }
 0x145   :  { %v1643_v59 = vadd.f32 %v1642_v43, %v1628_v29 }
 0x146   :  { %v1764_v27 = vmul.f32 0.2, %v1756_v58 }
 0x147   :  { %v1602_v17 = vpop.f32.mrf.mxu3  ;;  %v1644_v53 = vpop.f32.mrf.mxu0  ;;  %2274 = vmatpush.bf16.msrb.mxu0 %v3475_v57 }
 0x148   :  { %v1603_v20 = vadd.f32 %v1602_v17, %v1589_v16  ;;  %v1772_v33 = vmax.f32 %v1756_v58, %v1764_v27  ;;  %v1749_v58 = vperm.slane %v4099_v2, 3  ;;  %v3836_v2 = vld [vmem:[#allocation11 + $0x20] sm:$0xff] }
 0x14a   :  { %v1617_v25 = vadd.f32 %v1616_v22, %v1603_v20 }
 0x14b   :  { %2275 = vmatpush.bf16.msrb.mxu0 %v3467_v63 }
 0x14c   :  { %v1760_v28 = vadd.f32 %v1748_v60, %v1617_v25  ;;  %v1630_v54 = vpop.f32.mrf.mxu2  ;;  %v3451_v60 = vor.u32 %v3816_v42, %v3448_v10 }
 0x14d   :  { %v1645_v11 = vadd.f32 %v1644_v53, %v1630_v54 }
 0x14e   :  { %v1768_v30 = vmul.f32 0.2, %v1760_v28 }
 0x14f   :  { %2276 = vmatpush.bf16.msrb.mxu0 %v3459_v6 }
 0x150   :  { %v1776_v34 = vmax.f32 %v1760_v28, %v1768_v30 }
 0x152   :  { %v1780_v39 = vpack.c.bf16 %v1776_v34, %v1772_v33  ;;  %v3837_v33 = vld [vmem:[#allocation11 + $0x28] sm:$0xff]  ;;  %v3835_v34 = vld [vmem:[#allocation11 + $0x18] sm:$0xff] }
 0x153   :  { %2277 = vmatpush.bf16.msrb.mxu0 %v3451_v60  ;;  %2424 = vmatpush.bf16.msra.mxu3 %v3837_v33 }
 0x154   :  { %2208 = vmatmul.bf16.vlgmr.msra.gmra.mxu2 %v1780_v39 }
 0x157   :  { %2425 = vmatpush.bf16.msra.mxu3 %v3836_v2 }
 0x158   :  { %v1656_v51 = vpop.f32.mrf.mxu1 }
 0x159   :  { %v1657_v3 = vadd.f32 %v1656_v51, %v1643_v59 }
 0x15b   :  { %2426 = vmatpush.bf16.msra.mxu3 %v3835_v34 }
 0x15f   :  { %v1670_v55 = vpop.f32.mrf.mxu3  ;;  %v1698_v9 = vpop.f32.mrf.mxu0  ;;  %2427 = vmatpush.bf16.msra.mxu3 %v3834_v35 }
 0x160   :  { %v1671_v5 = vadd.f32 %v1670_v55, %v1657_v3  ;;  %v1658_v7 = vpop.f32.mrf.mxu1 }
 0x161   :  { %v1659_v13 = vadd.f32 %v1658_v7, %v1645_v11  ;;  %v1849_v7 = vperm.slane %v1846_v46, 1 }
 0x163   :  { %2428 = vmatpush.bf16.msra.mxu3 %v3833_v38 }
 0x164   :  { %v1684_v52 = vpop.f32.mrf.mxu2  ;;  %2264 = vmatmul.bf16.vlgmr.msrb.gmra.mxu2 %v1780_v39  ;;  %v3845_v39 = vld [vmem:[#allocation11 + $0x68] sm:$0xff] }
 0x165   :  { %v1685_v14 = vadd.f32 %v1684_v52, %v1671_v5  ;;  %2438 = vmatpush.bf16.msra.mxu1 %v3845_v39 }
 0x167   :  { %v1672_v12 = vpop.f32.mrf.mxu3  ;;  %v1699_v17 = vadd.f32 %v1698_v9, %v1685_v14  ;;  %v1700_v20 = vpop.f32.mrf.mxu0  ;;  %2429 = vmatpush.bf16.msra.mxu3 %v3832_v8 }
 0x168   :  { %v1673_v15 = vadd.f32 %v1672_v12, %v1659_v13 }
 0x169   :  { %2439 = vmatpush.bf16.msra.mxu1 %v3844_v40 }
 0x16c   :  { %v1686_v4 = vpop.f32.mrf.mxu2 }
 0x16d   :  { %v1687_v18 = vadd.f32 %v1686_v4, %v1673_v15  ;;  %2440 = vmatpush.bf16.msra.mxu1 %v3843_v41 }
 0x16f   :  { %v1701_v21 = vadd.f32 %v1700_v20, %v1687_v18 }
 0x171   :  { %2441 = vmatpush.bf16.msra.mxu1 %v3842_v44 }
 0x174   :  { %v1712_v16 = vpop.f32.mrf.mxu2 }
 0x175   :  { %v1713_v19 = vadd.f32 %v1712_v16, %v1699_v17  ;;  %2442 = vmatpush.bf16.msra.mxu1 %v3841_v47 }
 0x177   :  { %v1757_v22 = vadd.f32 %v1749_v58, %v1713_v19 }
 0x179   :  { %v1765_v25 = vmul.f32 0.2, %v1757_v22  ;;  %2443 = vmatpush.bf16.msra.mxu1 %v3840_v49 }
 0x17b   :  { %v1773_v28 = vmax.f32 %v1757_v22, %v1765_v25 }
 0x17c   :  { %v1714_v23 = vpop.f32.mrf.mxu2 }
 0x17d   :  { %v1715_v24 = vadd.f32 %v1714_v23, %v1701_v21 }
 0x17f   :  { %v1761_v26 = vadd.f32 %v1749_v58, %v1715_v24  ;;  %v2181_v43 = vpop.f32.mrf.mxu3 }
 0x180   :  { %v2182_v53 = vadd.f32 %v2181_v43, %v1848_v48 }
 0x181   :  { %v1769_v27 = vmul.f32 0.2, %v1761_v26 }
 0x183   :  { %v1777_v29 = vmax.f32 %v1761_v26, %v1769_v27 }
 0x185   :  { %v1781_v30 = vpack.c.bf16 %v1777_v29, %v1773_v28 }
 0x187   :  { %2222 = vmatmul.bf16.vlgmr.msra.gmra.mxu0 %v1781_v30  ;;  %v2183_v51 = vpop.f32.mrf.mxu3 }
 0x188   :  { %v2184_v57 = vadd.f32 %v2183_v51, %v1848_v48 }
 0x197   :  { %2278 = vmatmul.bf16.vlgmr.msrb.gmra.mxu0 %v1781_v30  ;;  %v2451_v30 = vstv %s4123_s0 }
 0x19b   :  { %v2195_v54 = vpop.f32.mrf.mxu1 }
 0x19c   :  { %v2196_v56 = vadd.f32 %v2195_v54, %v2182_v53 }
 0x19f   :  { %v2237_v63 = vpop.f32.mrf.mxu3 }
 0x1a0   :  { %v2238_v11 = vadd.f32 %v2237_v63, %v1849_v7 }
 0x1a3   :  { %v2197_v52 = vpop.f32.mrf.mxu1 }
 0x1a4   :  { %v2198_v61 = vadd.f32 %v2197_v52, %v2184_v57 }
 0x1a7   :  { %v2239_v13 = vpop.f32.mrf.mxu3 }
 0x1a8   :  { %v2240_v16 = vadd.f32 %v2239_v13, %v1849_v7 }
 0x1ab   :  { %v2251_v1 = vpop.f32.mrf.mxu1 }
 0x1ac   :  { %v2252_v60 = vadd.f32 %v2251_v1, %v2238_v11 }
 0x1b3   :  { %v2253_v15 = vpop.f32.mrf.mxu1 }
 0x1b4   :  { %v2254_v19 = vadd.f32 %v2253_v15, %v2240_v16 }
 0x1d7   :  { %v2209_v45 = vpop.f32.mrf.mxu2 }
 0x1d8   :  { %v2210_v59 = vadd.f32 %v2209_v45, %v2196_v56 }
 0x1df   :  { %v2211_v55 = vpop.f32.mrf.mxu2 }
 0x1e0   :  { %v2212_v0 = vadd.f32 %v2211_v55, %v2198_v61 }
 0x1e7   :  { %v2265_v6 = vpop.f32.mrf.mxu2 }
 0x1e8   :  { %v2266_v17 = vadd.f32 %v2265_v6, %v2252_v60 }
 0x1ef   :  { %v2267_v18 = vpop.f32.mrf.mxu2 }
 0x1f0   :  { %v2268_v20 = vadd.f32 %v2267_v18, %v2254_v19 }
 0x204   :  { %v2223_v37 = vpop.f32.mrf.mxu0 }
 0x205   :  { %v2224_v62 = vadd.f32 %v2223_v37, %v2210_v59 }
 0x207   :  { %v2284_v4 = vmul.f32 0.2, %v2224_v62 }
 0x209   :  { %v2288_v42 = vmax.f32 %v2224_v62, %v2284_v4 }
 0x20c   :  { %v2225_v3 = vpop.f32.mrf.mxu0 }
 0x20d   :  { %v2226_v5 = vadd.f32 %v2225_v3, %v2212_v0 }
 0x20f   :  { %v2286_v9 = vmul.f32 0.2, %v2226_v5 }
 0x211   :  { %v2290_v10 = vmax.f32 %v2226_v5, %v2286_v9 }
 0x213   :  { %v2292_v12 = vpack.c.bf16 %v2290_v10, %v2288_v42 }
 0x214   :  { %v2279_v14 = vpop.f32.mrf.mxu0 }
 0x215   :  { %2430 = vmatmul.bf16.vlgmr.msra.gmra.mxu3 %v2292_v12  ;;  %v2280_v58 = vadd.f32 %v2279_v14, %v2266_v17 }
 0x217   :  { %v2285_v22 = vmul.f32 0.2, %v2280_v58 }
 0x219   :  { %v2289_v25 = vmax.f32 %v2280_v58, %v2285_v22 }
 0x21c   :  { %v2281_v21 = vpop.f32.mrf.mxu0 }
 0x21d   :  { %v2282_v23 = vadd.f32 %v2281_v21, %v2268_v20 }
 0x21f   :  { %v2287_v24 = vmul.f32 0.2, %v2282_v23 }
 0x221   :  { %v2291_v26 = vmax.f32 %v2282_v23, %v2287_v24 }
 0x223   :  { %v2293_v27 = vpack.c.bf16 %v2291_v26, %v2289_v25 }
 0x225   :  { %2444 = vmatmul.bf16.vlgmr.msra.gmra.mxu1 %v2293_v27 }
 0x298   :  { %v2431_v28 = vpop.f32.mrf.mxu3 }
 0x2a0   :  { %v2433_v33 = vpop.f32.mrf.mxu3 }
 0x2a2   :  { %v2445_v29 = vpop.f32.mrf.mxu1 }
 0x2a3   :  { %v2446_v31 = vadd.f32 %v2445_v29, %v2431_v28 }
 0x2a5   :  { %v2452_v32 = vadd.f32 %v2451_v30, %v2446_v31 }
 0x2a7   :  { %2455 = vst.msk [vmem:[%s4130_s7] sm:$0xff] %vm2454_vm1, %v2452_v32 }
 0x2aa   :  { %v2447_v2 = vpop.f32.mrf.mxu1 }
 0x2ab   :  { %v2448_v34 = vadd.f32 %v2447_v2, %v2433_v33 }
 0x2ad   :  { %v2453_v50 = vadd.f32 %v2451_v30, %v2448_v34 }
 0x2af   :  { %2456 = vst.msk [vmem:[%s4130_s7 + $0x8] sm:$0xff] %vm2454_vm1, %v2453_v50 }
 0x2b0   :  { %2461 = vsyncpa [#allocation5], 1 }
 0x2b1   :  { %2462 = vsyncpa [#allocation7], 1 }
 0x2b2   :  { %2463 = vsyncpa [#allocation10], 1 }

</bundles_post_ra>
